<compile_context>
chip_gen: v7x
topology: tpu7x:2x2x1
jax: 0.10.0
libtpu: 0.0.40
codegen_flags: <defaults>
</compile_context>

<pallas_src>
import jax
import jax.numpy as jnp
import numpy as np
from jax.experimental import pallas as pl
from jax.experimental.pallas import tpu as pltpu


def _make_kernel(C, has_pad, dice_exp_bf16):
    def kernel(x_ref, t_ref, out_ref, scal_acc, num_acc, outsum_acc, hist_acc):
        h = pl.program_id(2)
        nh = pl.num_programs(2)

        x = x_ref[0].astype(jnp.float32)            # (C, HWt) logits, widened on-chip
        tgt = t_ref[0].astype(jnp.int32)            # (1, HWt) target class ids
        HWt = x.shape[1]

        # ---- channel softmax pieces (channels on sublanes, pixels on lanes) ----
        m = jnp.max(x, axis=0, keepdims=True)       # (1, HWt)
        e = jnp.exp(x - m)                          # (C, HWt)  (EUP pass #1)
        s = jnp.sum(e, axis=0, keepdims=True)       # (1, HWt)
        inv_s = pl.reciprocal(s, approx=True)       # EUP reciprocal, frees VPU
        p = e * inv_s                               # softmax(input, dim=1)

        # ---- target-class selects (no f32 one-hot multiplies) ----
        cls = jax.lax.broadcasted_iota(jnp.int32, (C, HWt), 0)
        tgt_mask = cls == tgt                       # padded lanes (tgt==C) never match

        x_at_t = jnp.sum(jnp.where(tgt_mask, x, 0.0), axis=0, keepdims=True)
        e_at_t = jnp.sum(jnp.where(tgt_mask, e, 0.0), axis=0, keepdims=True)
        p_at_t = e_at_t * inv_s                     # softmax at target class (no 2nd exp)

        ce_row = m + jnp.log(s) - x_at_t            # -log softmax at target class
        # TODO(synk): torch.argmax breaks ties by lowest index; equality with the
        # max is used instead (identical for continuous random inputs).
        correct_row = (x_at_t == m).astype(jnp.float32)
        inter_row = p_at_t
        y4_row = -jnp.log(p_at_t + 0.001)

        # ---- DiceLoss operand out = exp(softmax)  (EUP pass #2) ----
        if dice_exp_bf16:
            # Optional on v6e/v7x (bf16 EUP); ~4e-3 rel. error -> off by default.
            out = jnp.exp(p.astype(jnp.bfloat16)).astype(jnp.float32)
        else:
            out = jnp.exp(p)

        if has_pad:
            validf = (tgt < C).astype(jnp.float32)  # (1, HWt): 0 on padded lanes
            ce_row = ce_row * validf
            correct_row = correct_row * validf
            y4_row = y4_row * validf
            out = out * validf                      # drop padded pixels from Dice sums

        # ---- per-tile partial sums, kept as sublane columns (no scatter here) ----
        scal_upd = jnp.concatenate(
            [jnp.sum(ce_row, axis=1, keepdims=True),
             jnp.sum(correct_row, axis=1, keepdims=True),
             jnp.sum(inter_row, axis=1, keepdims=True),
             jnp.sum(y4_row, axis=1, keepdims=True)], axis=0)            # (4, 1)
        num_upd = jnp.sum(jnp.where(tgt_mask, out, 0.0), axis=1, keepdims=True)   # (C,1)
        outsum_upd = jnp.sum(out, axis=1, keepdims=True)                           # (C,1)
        hist_upd = jnp.sum(tgt_mask.astype(jnp.float32), axis=1, keepdims=True)    # (C,1)

        @pl.when(h == 0)
        def _():
            scal_acc[...] = scal_upd
            num_acc[...] = num_upd
            outsum_acc[...] = outsum_upd
            hist_acc[...] = hist_upd

        @pl.when(h > 0)
        def _():
            scal_acc[...] += scal_upd
            num_acc[...] += num_upd
            outsum_acc[...] += outsum_upd
            hist_acc[...] += hist_upd

        # ---- epilogue: assemble the lane-dense (8,128) block ONCE per split ----
        @pl.when(h == nh - 1)
        def _():
            lane_c = jax.lax.broadcasted_iota(jnp.int32, (C, 128), 1)
            sub_c = jax.lax.broadcasted_iota(jnp.int32, (C, 128), 0)
            sel = (lane_c == sub_c).astype(jnp.float32)          # identity scatter
            num_row = jnp.sum(num_acc[...] * sel, axis=0, keepdims=True)
            outsum_row = jnp.sum(outsum_acc[...] * sel, axis=0, keepdims=True)
            hist_row = jnp.sum(hist_acc[...] * sel, axis=0, keepdims=True)
            lane4 = jax.lax.broadcasted_iota(jnp.int32, (4, 128), 1)
            scal_rows = jnp.where(lane4 == 0, scal_acc[...], 0.0)   # (4, 128)
            # rows: [ce, correct, inter, y4, num_c, sum(out)_c, hist_c, 0]
            out_ref[0, 0] = jnp.concatenate(
                [scal_rows, num_row, outsum_row, hist_row,
                 jnp.zeros((1, 128), jnp.float32)], axis=0)

    return kernel


def _round_up(v, m):
    return -(-v // m) * m


def _pick_hw_tile(hw, c, f32_block_budget=(3 << 19)):   # ~1.5 MiB f32 per (C, tile)
    """Return (hw_tile, hw_pad): lane tile (multiple of 128) sized by a byte
    budget; prefer a tile dividing the 128-rounded HW (minimal padding),
    otherwise pad HW up to a multiple of the chosen tile."""
    hw128 = _round_up(hw, 128)
    target = max(128, ((f32_block_budget // (4 * c)) // 128) * 128)
    target = min(target, hw128)
    t = target
    while t >= max(128, target // 2):
        if hw128 % t == 0:
            return t, hw128
        t -= 128
    return target, _round_up(hw, target)


def combined_loss(logits_nchw, target_nhw, weight, num_classes, *, dice_exp_bf16=False):
    N, C, H, W = logits_nchw.shape
    assert C == num_classes and C <= 128
    HW = H * W

    hw_tile, hw_pad = _pick_hw_tile(HW, C)
    has_pad = hw_pad != HW
    n_hw = hw_pad // hw_tile
    # Split the HW loop in two "parallel" halves so both v7x TensorCores have
    # work even when N is small; each half owns its own output block.
    n_split = 2 if (n_hw >= 2 and n_hw % 2 == 0) else 1
    n_inner = n_hw // n_split

    x = logits_nchw.reshape(N, C, HW)                  # dtype preserved (bf16 ok)
    t = target_nhw.reshape(N, 1, HW).astype(jnp.int32)
    if has_pad:
        x = jnp.pad(x, ((0, 0), (0, 0), (0, hw_pad - HW)))
        # sentinel class == C: never matches a real class -> zero one-hot
        t = jnp.pad(t, ((0, 0), (0, 0), (0, hw_pad - HW)), constant_values=C)

    kernel = _make_kernel(C, has_pad, dice_exp_bf16)

    def run(x_in, t_in):
        x_bytes = C * hw_tile * jnp.dtype(x_in.dtype).itemsize
        t_bytes = hw_tile * jnp.dtype(t_in.dtype).itemsize
        est = (2 * (x_bytes + t_bytes)                 # double-buffered input blocks
               + 12 * C * hw_tile * 4                  # live f32 temporaries (generous)
               + 2 * 8 * 128 * 4                       # output block
               + (3 * _round_up(C, 8) + 8) * 128 * 4   # scratch columns (lane-padded)
               + (4 << 20))                            # headroom
        vmem_limit = int(min(48 << 20, max(est, 24 << 20)))
        return pl.pallas_call(
            kernel,
            out_shape=jax.ShapeDtypeStruct((N, n_split, 8, 128), jnp.float32),
            grid=(N, n_split, n_inner),
            in_specs=[pl.BlockSpec((1, C, hw_tile),
                                   lambda n, s, h: (n, 0, s * n_inner + h)),
                      pl.BlockSpec((1, 1, hw_tile),
                                   lambda n, s, h: (n, 0, s * n_inner + h))],
            out_specs=pl.BlockSpec((1, 1, 8, 128), lambda n, s, h: (n, s, 0, 0)),
            scratch_shapes=[pltpu.VMEM((4, 1), jnp.float32),
                            pltpu.VMEM((C, 1), jnp.float32),
                            pltpu.VMEM((C, 1), jnp.float32),
                            pltpu.VMEM((C, 1), jnp.float32)],
            compiler_params=pltpu.CompilerParams(
                dimension_semantics=("parallel", "parallel", "arbitrary"),
                vmem_limit_bytes=vmem_limit),
        )(x_in, t_in)

    # Narrow the target HBM stream (helps bandwidth-limited v5e) when the class
    # ids and padding sentinel fit in int8; fall back to int32 otherwise.
    max_tid = C if has_pad else C - 1
    out = None
    if max_tid <= 127:
        try:
            out = run(x, t.astype(jnp.int8))
        except Exception:
            out = None
    if out is None:
        out = run(x, t)

    red = jnp.sum(out, axis=1)                          # (N, 8, 128): sum HW splits
    ce_b = red[:, 0, 0]
    correct_b = red[:, 1, 0]
    inter = jnp.sum(red[:, 2, 0])
    y4_b = red[:, 3, 0]
    num_c = jnp.sum(red[:, 4, :C], axis=0)
    outsum_c = jnp.sum(red[:, 5, :C], axis=0)
    hist_c = jnp.sum(red[:, 6, :C], axis=0)

    npix = N * HW
    ce = jnp.sum(ce_b) / npix                           # F.cross_entropy(input, target)
    acc = jnp.sum(correct_b) / npix                     # mean(target == argmax(softmax))

    smooth = 1.0
    # sum(softmax) == sum(one_hot) == N*HW exactly (analytic identities).
    y3 = (2.0 * inter + smooth) / (2.0 * npix + smooth)

    y4 = y4_b / (C * HW)                                # per-sample mean over (C,H,W)

    eps_dice = 1e-4                                     # DiceLoss on exp(softmax)
    y2 = jnp.sum(1.0 - (2.0 * num_c) / (outsum_c + hist_c + eps_dice)) / C

    y1 = ce * jnp.mean(weight)                          # mean(CE * weight), CE is scalar
    y = y1 + y2
    # NOTE: the reference's `y0` (CE of softmaxed input * weight) is dead code
    # (never returned), so it is intentionally not computed here.
    return y, y3, y4, acc, y2


def _reference(logits, target, weight, num_classes):
    """Pure-JAX mirror of the PyTorch forward pass, for sanity checking."""
    N, C, H, W = logits.shape
    p = jax.nn.softmax(logits, axis=1)
    pred = jnp.argmax(p, axis=1)
    acc = jnp.mean((target == pred).astype(jnp.float32))
    onehot = jax.nn.one_hot(target, num_classes, axis=1, dtype=jnp.float32)
    smooth = 1.0
    y3 = (2.0 * jnp.sum(p * onehot) + smooth) / (jnp.sum(p) + jnp.sum(onehot) + smooth)
    out = jnp.exp(p)
    num_c = 2.0 * jnp.sum(out * onehot, axis=(0, 2, 3))
    den_c = jnp.sum(out + onehot, axis=(0, 2, 3)) + 1e-4
    y2 = jnp.sum(1.0 - num_c / den_c) / C
    logp = jax.nn.log_softmax(logits, axis=1)
    ce = -jnp.mean(jnp.sum(logp * onehot, axis=1))
    y1 = ce * jnp.mean(weight)
    y4 = jnp.mean(-jnp.log(p + 0.001) * onehot, axis=(1, 2, 3))
    return y1 + y2, y3, y4, acc, y2


if __name__ == "__main__":
    key = jax.random.PRNGKey(0)
    k1, k2, k3 = jax.random.split(key, 3)
    N, C, H, W = 2, 4, 16, 16

    logits = jax.random.normal(k1, (N, C, H, W), dtype=jnp.float32)
    target = jax.random.randint(k2, (N, H, W), 0, C, dtype=jnp.int32)
    weight = jax.random.uniform(k3, (N, C), dtype=jnp.float32)

    outs = jax.block_until_ready(combined_loss(logits, target, weight, C))
    refs = _reference(logits, target, weight, C)
    for got, ref in zip(outs, refs):
        np.testing.assert_allclose(np.asarray(got), np.asarray(ref),
                                   rtol=1e-3, atol=1e-3)

    # Non-128-multiple spatial size: exercises the HW padding + lane-mask path.
    H2 = W2 = 15
    logits2 = jax.random.normal(k1, (N, C, H2, W2), dtype=jnp.float32)
    target2 = jax.random.randint(k2, (N, H2, W2), 0, C, dtype=jnp.int32)
    outs2 = jax.block_until_ready(combined_loss(logits2, target2, weight, C))
    refs2 = _reference(logits2, target2, weight, C)
    for got, ref in zip(outs2, refs2):
        np.testing.assert_allclose(np.asarray(got), np.asarray(ref),
                                   rtol=1e-3, atol=1e-3)

    print("KERNEL_OK")
</pallas_src>

<mosaic_0001>
module attributes {stable_mosaic.version = 11 : i64} {
  func.func @kernel(%arg0: i32, %arg1: i32, %arg2: i32, %arg3: memref<1x4x256xf32, #tpu.memory_space<vmem>>, %arg4: memref<1x1x256xi8, #tpu.memory_space<vmem>>, %arg5: memref<1x1x8x128xf32, #tpu.memory_space<vmem>>, %arg6: memref<4x1xf32, #tpu.memory_space<vmem>>, %arg7: memref<4x1xf32, #tpu.memory_space<vmem>>, %arg8: memref<4x1xf32, #tpu.memory_space<vmem>>, %arg9: memref<4x1xf32, #tpu.memory_space<vmem>>) attributes {dimension_semantics = [#tpu.dimension_semantics<parallel>, #tpu.dimension_semantics<parallel>, #tpu.dimension_semantics<arbitrary>], iteration_bounds = array<i64: 2, 1, 1>, scalar_prefetch = 0 : i64, scratch_operands = 4 : i64, tpu.core_type = #tpu.core_type<tc>, window_params = [{transform_indices = @transform_0, window_bounds = array<i64: 1, 4, 256>}, {transform_indices = @transform_1, window_bounds = array<i64: 1, 1, 256>}, {transform_indices = @transform_2, window_bounds = array<i64: 1, 1, 8, 128>}]} {
    %c0 = arith.constant 0 : index
    %c0_0 = arith.constant 0 : index
    %c0_1 = arith.constant 0 : index
    %0 = vector.load %arg3[%c0, %c0_0, %c0_1] : memref<1x4x256xf32, #tpu.memory_space<vmem>>, vector<1x4x256xf32>
    %1 = vector.shape_cast %0 : vector<1x4x256xf32> to vector<4x256xf32>
    %c0_2 = arith.constant 0 : index
    %c0_3 = arith.constant 0 : index
    %c0_4 = arith.constant 0 : index
    %2 = vector.load %arg4[%c0_2, %c0_3, %c0_4] : memref<1x1x256xi8, #tpu.memory_space<vmem>>, vector<1x1x256xi8>
    %3 = vector.shape_cast %2 : vector<1x1x256xi8> to vector<1x256xi8>
    %4 = arith.extsi %3 : vector<1x256xi8> to vector<1x256xi32>
    %cst = arith.constant dense<0xFF800000> : vector<256xf32>
    %5 = vector.multi_reduction <maximumf>, %1, %cst [0] : vector<4x256xf32> to vector<256xf32>
    %6 = vector.shape_cast %5 : vector<256xf32> to vector<1x256xf32>
    %7 = vector.broadcast %6 : vector<1x256xf32> to vector<4x256xf32>
    %8 = arith.subf %1, %7 : vector<4x256xf32>
    %9 = math.exp %8 : vector<4x256xf32>
    %cst_5 = arith.constant dense<0.000000e+00> : vector<256xf32>
    %10 = vector.multi_reduction <add>, %9, %cst_5 [0] : vector<4x256xf32> to vector<256xf32>
    %11 = vector.shape_cast %10 : vector<256xf32> to vector<1x256xf32>
    %12 = tpu.reciprocal %11 {approx = true} : vector<1x256xf32> -> vector<1x256xf32>
    %13 = vector.broadcast %12 : vector<1x256xf32> to vector<4x256xf32>
    %14 = arith.mulf %9, %13 : vector<4x256xf32>
    %15 = tpu.iota {dimensions = array<i32: 0>} : vector<4x256xi32>
    %16 = vector.broadcast %4 : vector<1x256xi32> to vector<4x256xi32>
    %17 = arith.cmpi eq, %15, %16 : vector<4x256xi32>
    %cst_6 = arith.constant 0.000000e+00 : f32
    %18 = vector.broadcast %cst_6 : f32 to vector<4x256xf32>
    %19 = arith.select %17, %1, %18 : vector<4x256xi1>, vector<4x256xf32>
    %cst_7 = arith.constant dense<0.000000e+00> : vector<256xf32>
    %20 = vector.multi_reduction <add>, %19, %cst_7 [0] : vector<4x256xf32> to vector<256xf32>
    %21 = vector.shape_cast %20 : vector<256xf32> to vector<1x256xf32>
    %cst_8 = arith.constant 0.000000e+00 : f32
    %22 = vector.broadcast %cst_8 : f32 to vector<4x256xf32>
    %23 = arith.select %17, %9, %22 : vector<4x256xi1>, vector<4x256xf32>
    %cst_9 = arith.constant dense<0.000000e+00> : vector<256xf32>
    %24 = vector.multi_reduction <add>, %23, %cst_9 [0] : vector<4x256xf32> to vector<256xf32>
    %25 = vector.shape_cast %24 : vector<256xf32> to vector<1x256xf32>
    %26 = arith.mulf %25, %12 : vector<1x256xf32>
    %27 = math.log %11 : vector<1x256xf32>
    %28 = arith.addf %6, %27 : vector<1x256xf32>
    %29 = arith.subf %28, %21 : vector<1x256xf32>
    %30 = arith.cmpf oeq, %21, %6 : vector<1x256xf32>
    %31 = arith.extui %30 : vector<1x256xi1> to vector<1x256xi32>
    %32 = arith.sitofp %31 : vector<1x256xi32> to vector<1x256xf32>
    %cst_10 = arith.constant 1.000000e-03 : f32
    %33 = vector.broadcast %cst_10 : f32 to vector<1x256xf32>
    %34 = arith.addf %26, %33 : vector<1x256xf32>
    %35 = math.log %34 : vector<1x256xf32>
    %cst_11 = arith.constant 0.000000e+00 : f32
    %36 = vector.broadcast %cst_11 : f32 to vector<1x256xf32>
    %37 = arith.subf %36, %35 : vector<1x256xf32>
    %38 = math.exp %14 : vector<4x256xf32>
    %cst_12 = arith.constant dense<0.000000e+00> : vector<1xf32>
    %39 = vector.multi_reduction <add>, %29, %cst_12 [1] : vector<1x256xf32> to vector<1xf32>
    %40 = vector.shape_cast %39 : vector<1xf32> to vector<1x1xf32>
    %cst_13 = arith.constant dense<0.000000e+00> : vector<1xf32>
    %41 = vector.multi_reduction <add>, %32, %cst_13 [1] : vector<1x256xf32> to vector<1xf32>
    %42 = vector.shape_cast %41 : vector<1xf32> to vector<1x1xf32>
    %cst_14 = arith.constant dense<0.000000e+00> : vector<1xf32>
    %43 = vector.multi_reduction <add>, %26, %cst_14 [1] : vector<1x256xf32> to vector<1xf32>
    %44 = vector.shape_cast %43 : vector<1xf32> to vector<1x1xf32>
    %cst_15 = arith.constant dense<0.000000e+00> : vector<1xf32>
    %45 = vector.multi_reduction <add>, %37, %cst_15 [1] : vector<1x256xf32> to vector<1xf32>
    %46 = vector.shape_cast %45 : vector<1xf32> to vector<1x1xf32>
    %47 = tpu.concatenate %40, %42, %44, %46 in 0 : vector<1x1xf32>, vector<1x1xf32>, vector<1x1xf32>, vector<1x1xf32> -> vector<4x1xf32>
    %cst_16 = arith.constant 0.000000e+00 : f32
    %48 = vector.broadcast %cst_16 : f32 to vector<4x256xf32>
    %49 = arith.select %17, %38, %48 : vector<4x256xi1>, vector<4x256xf32>
    %cst_17 = arith.constant dense<0.000000e+00> : vector<4xf32>
    %50 = vector.multi_reduction <add>, %49, %cst_17 [1] : vector<4x256xf32> to vector<4xf32>
    %51 = vector.shape_cast %50 : vector<4xf32> to vector<4x1xf32>
    %cst_18 = arith.constant dense<0.000000e+00> : vector<4xf32>
    %52 = vector.multi_reduction <add>, %38, %cst_18 [1] : vector<4x256xf32> to vector<4xf32>
    %53 = vector.shape_cast %52 : vector<4xf32> to vector<4x1xf32>
    %54 = arith.extui %17 : vector<4x256xi1> to vector<4x256xi32>
    %55 = arith.sitofp %54 : vector<4x256xi32> to vector<4x256xf32>
    %cst_19 = arith.constant dense<0.000000e+00> : vector<4xf32>
    %56 = vector.multi_reduction <add>, %55, %cst_19 [1] : vector<4x256xf32> to vector<4xf32>
    %57 = vector.shape_cast %56 : vector<4xf32> to vector<4x1xf32>
    %c0_i32 = arith.constant 0 : i32
    %58 = arith.cmpi eq, %arg2, %c0_i32 : i32
    %59 = arith.extui %58 : i1 to i32
    %c0_i32_20 = arith.constant 0 : i32
    %60 = arith.cmpi ne, %59, %c0_i32_20 : i32
    scf.if %60 {
      %c0_25 = arith.constant 0 : index
      %c0_26 = arith.constant 0 : index
      %67 = vector.load %arg6[%c0_25, %c0_26] : memref<4x1xf32, #tpu.memory_space<vmem>>, vector<4x1xf32>
      tpu.vector_store %arg6[%c0_25, %c0_26], %47 {strides = array<i32>} : memref<4x1xf32, #tpu.memory_space<vmem>>, vector<4x1xf32>,
      %c0_27 = arith.constant 0 : index
      %c0_28 = arith.constant 0 : index
      %68 = vector.load %arg7[%c0_27, %c0_28] : memref<4x1xf32, #tpu.memory_space<vmem>>, vector<4x1xf32>
      tpu.vector_store %arg7[%c0_27, %c0_28], %51 {strides = array<i32>} : memref<4x1xf32, #tpu.memory_space<vmem>>, vector<4x1xf32>,
      %c0_29 = arith.constant 0 : index
      %c0_30 = arith.constant 0 : index
      %69 = vector.load %arg8[%c0_29, %c0_30] : memref<4x1xf32, #tpu.memory_space<vmem>>, vector<4x1xf32>
      tpu.vector_store %arg8[%c0_29, %c0_30], %53 {strides = array<i32>} : memref<4x1xf32, #tpu.memory_space<vmem>>, vector<4x1xf32>,
      %c0_31 = arith.constant 0 : index
      %c0_32 = arith.constant 0 : index
      %70 = vector.load %arg9[%c0_31, %c0_32] : memref<4x1xf32, #tpu.memory_space<vmem>>, vector<4x1xf32>
      tpu.vector_store %arg9[%c0_31, %c0_32], %57 {strides = array<i32>} : memref<4x1xf32, #tpu.memory_space<vmem>>, vector<4x1xf32>,
    } else {
    }
    %c0_i32_21 = arith.constant 0 : i32
    %61 = arith.cmpi sgt, %arg2, %c0_i32_21 : i32
    %62 = arith.extui %61 : i1 to i32
    %c0_i32_22 = arith.constant 0 : i32
    %63 = arith.cmpi ne, %62, %c0_i32_22 : i32
    scf.if %63 {
      %c0_25 = arith.constant 0 : index
      %c0_26 = arith.constant 0 : index
      %67 = vector.load %arg6[%c0_25, %c0_26] : memref<4x1xf32, #tpu.memory_space<vmem>>, vector<4x1xf32>
      %68 = arith.addf %67, %47 : vector<4x1xf32>
      %c0_27 = arith.constant 0 : index
      %c0_28 = arith.constant 0 : index
      %69 = vector.load %arg6[%c0_27, %c0_28] : memref<4x1xf32, #tpu.memory_space<vmem>>, vector<4x1xf32>
      tpu.vector_store %arg6[%c0_27, %c0_28], %68 {strides = array<i32>} : memref<4x1xf32, #tpu.memory_space<vmem>>, vector<4x1xf32>,
      %c0_29 = arith.constant 0 : index
      %c0_30 = arith.constant 0 : index
      %70 = vector.load %arg7[%c0_29, %c0_30] : memref<4x1xf32, #tpu.memory_space<vmem>>, vector<4x1xf32>
      %71 = arith.addf %70, %51 : vector<4x1xf32>
      %c0_31 = arith.constant 0 : index
      %c0_32 = arith.constant 0 : index
      %72 = vector.load %arg7[%c0_31, %c0_32] : memref<4x1xf32, #tpu.memory_space<vmem>>, vector<4x1xf32>
      tpu.vector_store %arg7[%c0_31, %c0_32], %71 {strides = array<i32>} : memref<4x1xf32, #tpu.memory_space<vmem>>, vector<4x1xf32>,
      %c0_33 = arith.constant 0 : index
      %c0_34 = arith.constant 0 : index
      %73 = vector.load %arg8[%c0_33, %c0_34] : memref<4x1xf32, #tpu.memory_space<vmem>>, vector<4x1xf32>
      %74 = arith.addf %73, %53 : vector<4x1xf32>
      %c0_35 = arith.constant 0 : index
      %c0_36 = arith.constant 0 : index
      %75 = vector.load %arg8[%c0_35, %c0_36] : memref<4x1xf32, #tpu.memory_space<vmem>>, vector<4x1xf32>
      tpu.vector_store %arg8[%c0_35, %c0_36], %74 {strides = array<i32>} : memref<4x1xf32, #tpu.memory_space<vmem>>, vector<4x1xf32>,
      %c0_37 = arith.constant 0 : index
      %c0_38 = arith.constant 0 : index
      %76 = vector.load %arg9[%c0_37, %c0_38] : memref<4x1xf32, #tpu.memory_space<vmem>>, vector<4x1xf32>
      %77 = arith.addf %76, %57 : vector<4x1xf32>
      %c0_39 = arith.constant 0 : index
      %c0_40 = arith.constant 0 : index
      %78 = vector.load %arg9[%c0_39, %c0_40] : memref<4x1xf32, #tpu.memory_space<vmem>>, vector<4x1xf32>
      tpu.vector_store %arg9[%c0_39, %c0_40], %77 {strides = array<i32>} : memref<4x1xf32, #tpu.memory_space<vmem>>, vector<4x1xf32>,
    } else {
    }
    %c0_i32_23 = arith.constant 0 : i32
    %64 = arith.cmpi eq, %arg2, %c0_i32_23 : i32
    %65 = arith.extui %64 : i1 to i32
    %c0_i32_24 = arith.constant 0 : i32
    %66 = arith.cmpi ne, %65, %c0_i32_24 : i32
    scf.if %66 {
      %67 = tpu.iota {dimensions = array<i32: 1>} : vector<4x128xi32>
      %68 = tpu.iota {dimensions = array<i32: 0>} : vector<4x128xi32>
      %69 = arith.cmpi eq, %67, %68 : vector<4x128xi32>
      %70 = arith.extui %69 : vector<4x128xi1> to vector<4x128xi32>
      %71 = arith.sitofp %70 : vector<4x128xi32> to vector<4x128xf32>
      %c0_25 = arith.constant 0 : index
      %c0_26 = arith.constant 0 : index
      %72 = vector.load %arg7[%c0_25, %c0_26] : memref<4x1xf32, #tpu.memory_space<vmem>>, vector<4x1xf32>
      %73 = vector.broadcast %72 : vector<4x1xf32> to vector<4x128xf32>
      %74 = arith.mulf %73, %71 : vector<4x128xf32>
      %cst_27 = arith.constant dense<0.000000e+00> : vector<128xf32>
      %75 = vector.multi_reduction <add>, %74, %cst_27 [0] : vector<4x128xf32> to vector<128xf32>
      %76 = vector.shape_cast %75 : vector<128xf32> to vector<1x128xf32>
      %c0_28 = arith.constant 0 : index
      %c0_29 = arith.constant 0 : index
      %77 = vector.load %arg8[%c0_28, %c0_29] : memref<4x1xf32, #tpu.memory_space<vmem>>, vector<4x1xf32>
      %78 = vector.broadcast %77 : vector<4x1xf32> to vector<4x128xf32>
      %79 = arith.mulf %78, %71 : vector<4x128xf32>
      %cst_30 = arith.constant dense<0.000000e+00> : vector<128xf32>
      %80 = vector.multi_reduction <add>, %79, %cst_30 [0] : vector<4x128xf32> to vector<128xf32>
      %81 = vector.shape_cast %80 : vector<128xf32> to vector<1x128xf32>
      %c0_31 = arith.constant 0 : index
      %c0_32 = arith.constant 0 : index
      %82 = vector.load %arg9[%c0_31, %c0_32] : memref<4x1xf32, #tpu.memory_space<vmem>>, vector<4x1xf32>
      %83 = vector.broadcast %82 : vector<4x1xf32> to vector<4x128xf32>
      %84 = arith.mulf %83, %71 : vector<4x128xf32>
      %cst_33 = arith.constant dense<0.000000e+00> : vector<128xf32>
      %85 = vector.multi_reduction <add>, %84, %cst_33 [0] : vector<4x128xf32> to vector<128xf32>
      %86 = vector.shape_cast %85 : vector<128xf32> to vector<1x128xf32>
      %87 = tpu.iota {dimensions = array<i32: 1>} : vector<4x128xi32>
      %c0_i32_34 = arith.constant 0 : i32
      %88 = vector.broadcast %c0_i32_34 : i32 to vector<4x128xi32>
      %89 = arith.cmpi eq, %87, %88 : vector<4x128xi32>
      %c0_35 = arith.constant 0 : index
      %c0_36 = arith.constant 0 : index
      %90 = vector.load %arg6[%c0_35, %c0_36] : memref<4x1xf32, #tpu.memory_space<vmem>>, vector<4x1xf32>
      %cst_37 = arith.constant 0.000000e+00 : f32
      %91 = vector.shape_cast %90 : vector<4x1xf32> to vector<4x1xf32>
      %92 = vector.broadcast %91 : vector<4x1xf32> to vector<4x128xf32>
      %93 = vector.broadcast %cst_37 : f32 to vector<4x128xf32>
      %94 = arith.select %89, %92, %93 : vector<4x128xi1>, vector<4x128xf32>
      %cst_38 = arith.constant 0.000000e+00 : f32
      %95 = vector.broadcast %cst_38 : f32 to vector<1x128xf32>
      %96 = tpu.concatenate %94, %76, %81, %86, %95 in 0 : vector<4x128xf32>, vector<1x128xf32>, vector<1x128xf32>, vector<1x128xf32>, vector<1x128xf32> -> vector<8x128xf32>
      %c0_39 = arith.constant 0 : index
      %c0_40 = arith.constant 0 : index
      %c0_41 = arith.constant 0 : index
      %c0_42 = arith.constant 0 : index
      %97 = vector.load %arg5[%c0_39, %c0_40, %c0_41, %c0_42] : memref<1x1x8x128xf32, #tpu.memory_space<vmem>>, vector<1x1x8x128xf32>
      %98 = vector.shape_cast %97 : vector<1x1x8x128xf32> to vector<8x128xf32>
      %99 = vector.shape_cast %96 : vector<8x128xf32> to vector<1x1x8x128xf32>
      tpu.vector_store %arg5[%c0_39, %c0_40, %c0_41, %c0_42], %99 {strides = array<i32>} : memref<1x1x8x128xf32, #tpu.memory_space<vmem>>, vector<1x1x8x128xf32>,
    } else {
    }
    return
  }
  func.func @transform_0(%arg0: i32, %arg1: i32, %arg2: i32) -> (i32, i32, i32) {
    %c1_i32 = arith.constant 1 : i32
    %0 = arith.muli %arg1, %c1_i32 : i32
    %1 = arith.addi %0, %arg2 : i32
    %c0_i32 = arith.constant 0 : i32
    %c0_i32_0 = arith.constant 0 : i32
    return %arg0, %c0_i32, %1 : i32, i32, i32
  }
  func.func @transform_1(%arg0: i32, %arg1: i32, %arg2: i32) -> (i32, i32, i32) {
    %c1_i32 = arith.constant 1 : i32
    %0 = arith.muli %arg1, %c1_i32 : i32
    %1 = arith.addi %0, %arg2 : i32
    %c0_i32 = arith.constant 0 : i32
    %c0_i32_0 = arith.constant 0 : i32
    return %arg0, %c0_i32, %1 : i32, i32, i32
  }
  func.func @transform_2(%arg0: i32, %arg1: i32, %arg2: i32) -> (i32, i32, i32, i32) {
    %c0_i32 = arith.constant 0 : i32
    %c0_i32_0 = arith.constant 0 : i32
    %c0_i32_1 = arith.constant 0 : i32
    return %arg0, %arg1, %c0_i32, %c0_i32_0 : i32, i32, i32, i32
  }
}

module attributes {stable_mosaic.version = 11 : i64} {
  func.func @kernel(%arg0: i32, %arg1: i32, %arg2: i32, %arg3: memref<1x4x256xf32, #tpu.memory_space<vmem>>, %arg4: memref<1x1x256xi32, #tpu.memory_space<vmem>>, %arg5: memref<1x1x8x128xf32, #tpu.memory_space<vmem>>, %arg6: memref<4x1xf32, #tpu.memory_space<vmem>>, %arg7: memref<4x1xf32, #tpu.memory_space<vmem>>, %arg8: memref<4x1xf32, #tpu.memory_space<vmem>>, %arg9: memref<4x1xf32, #tpu.memory_space<vmem>>) attributes {dimension_semantics = [#tpu.dimension_semantics<parallel>, #tpu.dimension_semantics<parallel>, #tpu.dimension_semantics<arbitrary>], iteration_bounds = array<i64: 2, 1, 1>, scalar_prefetch = 0 : i64, scratch_operands = 4 : i64, tpu.core_type = #tpu.core_type<tc>, window_params = [{transform_indices = @transform_0, window_bounds = array<i64: 1, 4, 256>}, {transform_indices = @transform_1, window_bounds = array<i64: 1, 1, 256>}, {transform_indices = @transform_2, window_bounds = array<i64: 1, 1, 8, 128>}]} {
    %c0 = arith.constant 0 : index
    %c0_0 = arith.constant 0 : index
    %c0_1 = arith.constant 0 : index
    %0 = vector.load %arg3[%c0, %c0_0, %c0_1] : memref<1x4x256xf32, #tpu.memory_space<vmem>>, vector<1x4x256xf32>
    %1 = vector.shape_cast %0 : vector<1x4x256xf32> to vector<4x256xf32>
    %c0_2 = arith.constant 0 : index
    %c0_3 = arith.constant 0 : index
    %c0_4 = arith.constant 0 : index
    %2 = vector.load %arg4[%c0_2, %c0_3, %c0_4] : memref<1x1x256xi32, #tpu.memory_space<vmem>>, vector<1x1x256xi32>
    %3 = vector.shape_cast %2 : vector<1x1x256xi32> to vector<1x256xi32>
    %cst = arith.constant dense<0xFF800000> : vector<256xf32>
    %4 = vector.multi_reduction <maximumf>, %1, %cst [0] : vector<4x256xf32> to vector<256xf32>
    %5 = vector.shape_cast %4 : vector<256xf32> to vector<1x256xf32>
    %6 = vector.broadcast %5 : vector<1x256xf32> to vector<4x256xf32>
    %7 = arith.subf %1, %6 : vector<4x256xf32>
    %8 = math.exp %7 : vector<4x256xf32>
    %cst_5 = arith.constant dense<0.000000e+00> : vector<256xf32>
    %9 = vector.multi_reduction <add>, %8, %cst_5 [0] : vector<4x256xf32> to vector<256xf32>
    %10 = vector.shape_cast %9 : vector<256xf32> to vector<1x256xf32>
    %11 = tpu.reciprocal %10 {approx = true} : vector<1x256xf32> -> vector<1x256xf32>
    %12 = vector.broadcast %11 : vector<1x256xf32> to vector<4x256xf32>
    %13 = arith.mulf %8, %12 : vector<4x256xf32>
    %14 = tpu.iota {dimensions = array<i32: 0>} : vector<4x256xi32>
    %15 = vector.broadcast %3 : vector<1x256xi32> to vector<4x256xi32>
    %16 = arith.cmpi eq, %14, %15 : vector<4x256xi32>
    %cst_6 = arith.constant 0.000000e+00 : f32
    %17 = vector.broadcast %cst_6 : f32 to vector<4x256xf32>
    %18 = arith.select %16, %1, %17 : vector<4x256xi1>, vector<4x256xf32>
    %cst_7 = arith.constant dense<0.000000e+00> : vector<256xf32>
    %19 = vector.multi_reduction <add>, %18, %cst_7 [0] : vector<4x256xf32> to vector<256xf32>
    %20 = vector.shape_cast %19 : vector<256xf32> to vector<1x256xf32>
    %cst_8 = arith.constant 0.000000e+00 : f32
    %21 = vector.broadcast %cst_8 : f32 to vector<4x256xf32>
    %22 = arith.select %16, %8, %21 : vector<4x256xi1>, vector<4x256xf32>
    %cst_9 = arith.constant dense<0.000000e+00> : vector<256xf32>
    %23 = vector.multi_reduction <add>, %22, %cst_9 [0] : vector<4x256xf32> to vector<256xf32>
    %24 = vector.shape_cast %23 : vector<256xf32> to vector<1x256xf32>
    %25 = arith.mulf %24, %11 : vector<1x256xf32>
    %26 = math.log %10 : vector<1x256xf32>
    %27 = arith.addf %5, %26 : vector<1x256xf32>
    %28 = arith.subf %27, %20 : vector<1x256xf32>
    %29 = arith.cmpf oeq, %20, %5 : vector<1x256xf32>
    %30 = arith.extui %29 : vector<1x256xi1> to vector<1x256xi32>
    %31 = arith.sitofp %30 : vector<1x256xi32> to vector<1x256xf32>
    %cst_10 = arith.constant 1.000000e-03 : f32
    %32 = vector.broadcast %cst_10 : f32 to vector<1x256xf32>
    %33 = arith.addf %25, %32 : vector<1x256xf32>
    %34 = math.log %33 : vector<1x256xf32>
    %cst_11 = arith.constant 0.000000e+00 : f32
    %35 = vector.broadcast %cst_11 : f32 to vector<1x256xf32>
    %36 = arith.subf %35, %34 : vector<1x256xf32>
    %37 = math.exp %13 : vector<4x256xf32>
    %cst_12 = arith.constant dense<0.000000e+00> : vector<1xf32>
    %38 = vector.multi_reduction <add>, %28, %cst_12 [1] : vector<1x256xf32> to vector<1xf32>
    %39 = vector.shape_cast %38 : vector<1xf32> to vector<1x1xf32>
    %cst_13 = arith.constant dense<0.000000e+00> : vector<1xf32>
    %40 = vector.multi_reduction <add>, %31, %cst_13 [1] : vector<1x256xf32> to vector<1xf32>
    %41 = vector.shape_cast %40 : vector<1xf32> to vector<1x1xf32>
    %cst_14 = arith.constant dense<0.000000e+00> : vector<1xf32>
    %42 = vector.multi_reduction <add>, %25, %cst_14 [1] : vector<1x256xf32> to vector<1xf32>
    %43 = vector.shape_cast %42 : vector<1xf32> to vector<1x1xf32>
    %cst_15 = arith.constant dense<0.000000e+00> : vector<1xf32>
    %44 = vector.multi_reduction <add>, %36, %cst_15 [1] : vector<1x256xf32> to vector<1xf32>
    %45 = vector.shape_cast %44 : vector<1xf32> to vector<1x1xf32>
    %46 = tpu.concatenate %39, %41, %43, %45 in 0 : vector<1x1xf32>, vector<1x1xf32>, vector<1x1xf32>, vector<1x1xf32> -> vector<4x1xf32>
    %cst_16 = arith.constant 0.000000e+00 : f32
    %47 = vector.broadcast %cst_16 : f32 to vector<4x256xf32>
    %48 = arith.select %16, %37, %47 : vector<4x256xi1>, vector<4x256xf32>
    %cst_17 = arith.constant dense<0.000000e+00> : vector<4xf32>
    %49 = vector.multi_reduction <add>, %48, %cst_17 [1] : vector<4x256xf32> to vector<4xf32>
    %50 = vector.shape_cast %49 : vector<4xf32> to vector<4x1xf32>
    %cst_18 = arith.constant dense<0.000000e+00> : vector<4xf32>
    %51 = vector.multi_reduction <add>, %37, %cst_18 [1] : vector<4x256xf32> to vector<4xf32>
    %52 = vector.shape_cast %51 : vector<4xf32> to vector<4x1xf32>
    %53 = arith.extui %16 : vector<4x256xi1> to vector<4x256xi32>
    %54 = arith.sitofp %53 : vector<4x256xi32> to vector<4x256xf32>
    %cst_19 = arith.constant dense<0.000000e+00> : vector<4xf32>
    %55 = vector.multi_reduction <add>, %54, %cst_19 [1] : vector<4x256xf32> to vector<4xf32>
    %56 = vector.shape_cast %55 : vector<4xf32> to vector<4x1xf32>
    %c0_i32 = arith.constant 0 : i32
    %57 = arith.cmpi eq, %arg2, %c0_i32 : i32
    %58 = arith.extui %57 : i1 to i32
    %c0_i32_20 = arith.constant 0 : i32
    %59 = arith.cmpi ne, %58, %c0_i32_20 : i32
    scf.if %59 {
      %c0_25 = arith.constant 0 : index
      %c0_26 = arith.constant 0 : index
      %66 = vector.load %arg6[%c0_25, %c0_26] : memref<4x1xf32, #tpu.memory_space<vmem>>, vector<4x1xf32>
      tpu.vector_store %arg6[%c0_25, %c0_26], %46 {strides = array<i32>} : memref<4x1xf32, #tpu.memory_space<vmem>>, vector<4x1xf32>,
      %c0_27 = arith.constant 0 : index
      %c0_28 = arith.constant 0 : index
      %67 = vector.load %arg7[%c0_27, %c0_28] : memref<4x1xf32, #tpu.memory_space<vmem>>, vector<4x1xf32>
      tpu.vector_store %arg7[%c0_27, %c0_28], %50 {strides = array<i32>} : memref<4x1xf32, #tpu.memory_space<vmem>>, vector<4x1xf32>,
      %c0_29 = arith.constant 0 : index
      %c0_30 = arith.constant 0 : index
      %68 = vector.load %arg8[%c0_29, %c0_30] : memref<4x1xf32, #tpu.memory_space<vmem>>, vector<4x1xf32>
      tpu.vector_store %arg8[%c0_29, %c0_30], %52 {strides = array<i32>} : memref<4x1xf32, #tpu.memory_space<vmem>>, vector<4x1xf32>,
      %c0_31 = arith.constant 0 : index
      %c0_32 = arith.constant 0 : index
      %69 = vector.load %arg9[%c0_31, %c0_32] : memref<4x1xf32, #tpu.memory_space<vmem>>, vector<4x1xf32>
      tpu.vector_store %arg9[%c0_31, %c0_32], %56 {strides = array<i32>} : memref<4x1xf32, #tpu.memory_space<vmem>>, vector<4x1xf32>,
    } else {
    }
    %c0_i32_21 = arith.constant 0 : i32
    %60 = arith.cmpi sgt, %arg2, %c0_i32_21 : i32
    %61 = arith.extui %60 : i1 to i32
    %c0_i32_22 = arith.constant 0 : i32
    %62 = arith.cmpi ne, %61, %c0_i32_22 : i32
    scf.if %62 {
      %c0_25 = arith.constant 0 : index
      %c0_26 = arith.constant 0 : index
      %66 = vector.load %arg6[%c0_25, %c0_26] : memref<4x1xf32, #tpu.memory_space<vmem>>, vector<4x1xf32>
      %67 = arith.addf %66, %46 : vector<4x1xf32>
      %c0_27 = arith.constant 0 : index
      %c0_28 = arith.constant 0 : index
      %68 = vector.load %arg6[%c0_27, %c0_28] : memref<4x1xf32, #tpu.memory_space<vmem>>, vector<4x1xf32>
      tpu.vector_store %arg6[%c0_27, %c0_28], %67 {strides = array<i32>} : memref<4x1xf32, #tpu.memory_space<vmem>>, vector<4x1xf32>,
      %c0_29 = arith.constant 0 : index
      %c0_30 = arith.constant 0 : index
      %69 = vector.load %arg7[%c0_29, %c0_30] : memref<4x1xf32, #tpu.memory_space<vmem>>, vector<4x1xf32>
      %70 = arith.addf %69, %50 : vector<4x1xf32>
      %c0_31 = arith.constant 0 : index
      %c0_32 = arith.constant 0 : index
      %71 = vector.load %arg7[%c0_31, %c0_32] : memref<4x1xf32, #tpu.memory_space<vmem>>, vector<4x1xf32>
      tpu.vector_store %arg7[%c0_31, %c0_32], %70 {strides = array<i32>} : memref<4x1xf32, #tpu.memory_space<vmem>>, vector<4x1xf32>,
      %c0_33 = arith.constant 0 : index
      %c0_34 = arith.constant 0 : index
      %72 = vector.load %arg8[%c0_33, %c0_34] : memref<4x1xf32, #tpu.memory_space<vmem>>, vector<4x1xf32>
      %73 = arith.addf %72, %52 : vector<4x1xf32>
      %c0_35 = arith.constant 0 : index
      %c0_36 = arith.constant 0 : index
      %74 = vector.load %arg8[%c0_35, %c0_36] : memref<4x1xf32, #tpu.memory_space<vmem>>, vector<4x1xf32>
      tpu.vector_store %arg8[%c0_35, %c0_36], %73 {strides = array<i32>} : memref<4x1xf32, #tpu.memory_space<vmem>>, vector<4x1xf32>,
      %c0_37 = arith.constant 0 : index
      %c0_38 = arith.constant 0 : index
      %75 = vector.load %arg9[%c0_37, %c0_38] : memref<4x1xf32, #tpu.memory_space<vmem>>, vector<4x1xf32>
      %76 = arith.addf %75, %56 : vector<4x1xf32>
      %c0_39 = arith.constant 0 : index
      %c0_40 = arith.constant 0 : index
      %77 = vector.load %arg9[%c0_39, %c0_40] : memref<4x1xf32, #tpu.memory_space<vmem>>, vector<4x1xf32>
      tpu.vector_store %arg9[%c0_39, %c0_40], %76 {strides = array<i32>} : memref<4x1xf32, #tpu.memory_space<vmem>>, vector<4x1xf32>,
    } else {
    }
    %c0_i32_23 = arith.constant 0 : i32
    %63 = arith.cmpi eq, %arg2, %c0_i32_23 : i32
    %64 = arith.extui %63 : i1 to i32
    %c0_i32_24 = arith.constant 0 : i32
    %65 = arith.cmpi ne, %64, %c0_i32_24 : i32
    scf.if %65 {
      %66 = tpu.iota {dimensions = array<i32: 1>} : vector<4x128xi32>
      %67 = tpu.iota {dimensions = array<i32: 0>} : vector<4x128xi32>
      %68 = arith.cmpi eq, %66, %67 : vector<4x128xi32>
      %69 = arith.extui %68 : vector<4x128xi1> to vector<4x128xi32>
      %70 = arith.sitofp %69 : vector<4x128xi32> to vector<4x128xf32>
      %c0_25 = arith.constant 0 : index
      %c0_26 = arith.constant 0 : index
      %71 = vector.load %arg7[%c0_25, %c0_26] : memref<4x1xf32, #tpu.memory_space<vmem>>, vector<4x1xf32>
      %72 = vector.broadcast %71 : vector<4x1xf32> to vector<4x128xf32>
      %73 = arith.mulf %72, %70 : vector<4x128xf32>
      %cst_27 = arith.constant dense<0.000000e+00> : vector<128xf32>
      %74 = vector.multi_reduction <add>, %73, %cst_27 [0] : vector<4x128xf32> to vector<128xf32>
      %75 = vector.shape_cast %74 : vector<128xf32> to vector<1x128xf32>
      %c0_28 = arith.constant 0 : index
      %c0_29 = arith.constant 0 : index
      %76 = vector.load %arg8[%c0_28, %c0_29] : memref<4x1xf32, #tpu.memory_space<vmem>>, vector<4x1xf32>
      %77 = vector.broadcast %76 : vector<4x1xf32> to vector<4x128xf32>
      %78 = arith.mulf %77, %70 : vector<4x128xf32>
      %cst_30 = arith.constant dense<0.000000e+00> : vector<128xf32>
      %79 = vector.multi_reduction <add>, %78, %cst_30 [0] : vector<4x128xf32> to vector<128xf32>
      %80 = vector.shape_cast %79 : vector<128xf32> to vector<1x128xf32>
      %c0_31 = arith.constant 0 : index
      %c0_32 = arith.constant 0 : index
      %81 = vector.load %arg9[%c0_31, %c0_32] : memref<4x1xf32, #tpu.memory_space<vmem>>, vector<4x1xf32>
      %82 = vector.broadcast %81 : vector<4x1xf32> to vector<4x128xf32>
      %83 = arith.mulf %82, %70 : vector<4x128xf32>
      %cst_33 = arith.constant dense<0.000000e+00> : vector<128xf32>
      %84 = vector.multi_reduction <add>, %83, %cst_33 [0] : vector<4x128xf32> to vector<128xf32>
      %85 = vector.shape_cast %84 : vector<128xf32> to vector<1x128xf32>
      %86 = tpu.iota {dimensions = array<i32: 1>} : vector<4x128xi32>
      %c0_i32_34 = arith.constant 0 : i32
      %87 = vector.broadcast %c0_i32_34 : i32 to vector<4x128xi32>
      %88 = arith.cmpi eq, %86, %87 : vector<4x128xi32>
      %c0_35 = arith.constant 0 : index
      %c0_36 = arith.constant 0 : index
      %89 = vector.load %arg6[%c0_35, %c0_36] : memref<4x1xf32, #tpu.memory_space<vmem>>, vector<4x1xf32>
      %cst_37 = arith.constant 0.000000e+00 : f32
      %90 = vector.shape_cast %89 : vector<4x1xf32> to vector<4x1xf32>
      %91 = vector.broadcast %90 : vector<4x1xf32> to vector<4x128xf32>
      %92 = vector.broadcast %cst_37 : f32 to vector<4x128xf32>
      %93 = arith.select %88, %91, %92 : vector<4x128xi1>, vector<4x128xf32>
      %cst_38 = arith.constant 0.000000e+00 : f32
      %94 = vector.broadcast %cst_38 : f32 to vector<1x128xf32>
      %95 = tpu.concatenate %93, %75, %80, %85, %94 in 0 : vector<4x128xf32>, vector<1x128xf32>, vector<1x128xf32>, vector<1x128xf32>, vector<1x128xf32> -> vector<8x128xf32>
      %c0_39 = arith.constant 0 : index
      %c0_40 = arith.constant 0 : index
      %c0_41 = arith.constant 0 : index
      %c0_42 = arith.constant 0 : index
      %96 = vector.load %arg5[%c0_39, %c0_40, %c0_41, %c0_42] : memref<1x1x8x128xf32, #tpu.memory_space<vmem>>, vector<1x1x8x128xf32>
      %97 = vector.shape_cast %96 : vector<1x1x8x128xf32> to vector<8x128xf32>
      %98 = vector.shape_cast %95 : vector<8x128xf32> to vector<1x1x8x128xf32>
      tpu.vector_store %arg5[%c0_39, %c0_40, %c0_41, %c0_42], %98 {strides = array<i32>} : memref<1x1x8x128xf32, #tpu.memory_space<vmem>>, vector<1x1x8x128xf32>,
    } else {
    }
    return
  }
  func.func @transform_0(%arg0: i32, %arg1: i32, %arg2: i32) -> (i32, i32, i32) {
    %c1_i32 = arith.constant 1 : i32
    %0 = arith.muli %arg1, %c1_i32 : i32
    %1 = arith.addi %0, %arg2 : i32
    %c0_i32 = arith.constant 0 : i32
    %c0_i32_0 = arith.constant 0 : i32
    return %arg0, %c0_i32, %1 : i32, i32, i32
  }
  func.func @transform_1(%arg0: i32, %arg1: i32, %arg2: i32) -> (i32, i32, i32) {
    %c1_i32 = arith.constant 1 : i32
    %0 = arith.muli %arg1, %c1_i32 : i32
    %1 = arith.addi %0, %arg2 : i32
    %c0_i32 = arith.constant 0 : i32
    %c0_i32_0 = arith.constant 0 : i32
    return %arg0, %c0_i32, %1 : i32, i32, i32
  }
  func.func @transform_2(%arg0: i32, %arg1: i32, %arg2: i32) -> (i32, i32, i32, i32) {
    %c0_i32 = arith.constant 0 : i32
    %c0_i32_0 = arith.constant 0 : i32
    %c0_i32_1 = arith.constant 0 : i32
    return %arg0, %arg1, %c0_i32, %c0_i32_0 : i32, i32, i32, i32
  }
}

</mosaic_0001>

<bundles_post_ra>
// kernel: tpu_custom_call.1
= control target key start
LH: loop header
LB: loop body
LE: loop exit
PB: predicated region body
PF: predicated region fallthrough
CT: control target
= control target key end

     0   :  { %7 = vsyncpa [#allocation7], 0  ;;  %s1105_s0 = inlined_call_operand.hbm [shape: f32[2,4,256], index: 0, kind: input, shape index: {}]   ;;  %s1106_s1 = inlined_call_operand.vmem [shape: s8[2,1,256], index: 1, kind: input, shape index: {}]   ;;  %s1107_s2 = inlined_call_operand.hbm [shape: f32[2,1,8,128], index: 2, kind: output, shape index: {}]  }
   0x1   :  { %9 = vsyncpa [#allocation7 + $0x1], 0 }
   0x2   :  { %10 = vsyncpa [#allocation8], 0 }
   0x3   :  { %12 = vsyncpa [#allocation8 + $0x1], 0  ;;  %s847_s9 = smov 0   ;;  %s849_s10 = smov 0  }
   0x4   :  { %s851_s11 = smov 0   ;;  %s853_s12 = smov 0  }
   0x5   :  { %s855_s13 = smov 0   ;;  %s857_s14 = smov 0  }
   0x6 LB: > { %s610_s15 = sadd.s32 4294967295, %s826_s14   ;;  %s611_s16 = sadd.s32 4294967294, %s826_s14   ;;  %s826_s14 = sphi %s857_s14, %s18_s14   ;;  %s822_s13 = sphi %s855_s13, %s1127_s13   ;;  %s818_s12 = sphi %s853_s12, %s1126_s12   ;;  %s814_s11 = sphi %s851_s11, %s1125_s11   ;;  %s810_s10 = sphi %s849_s10, %s1124_s10   ;;  %s806_s9 = sphi %s847_s9, %s1123_s9  }
   0x7   : > { %s37_s17 = sadd.s32 1, %s822_s13  ;;  %s48_s18 = sadd.s32 1, %s814_s11 }
   0x8   : > { %p39_p0 = scmp.ge.s32.totalorder %s37_s17, 2  ;;  %p55_p1 = scmp.ne.s32.totalorder %s814_s11, %s810_s10 }
   0x9   : > { %p56_p2 = scmp.eq.s32.totalorder %s826_s14, 0  ;;  %p61_p3 = scmp.ne.s32.totalorder %s810_s10, %s806_s9 }
   0xa   : > { %s1129_s17 = smov (%p39_p0, %s37_s17), 0  ;;  %p62_p5 = scmp.eq.s32.totalorder %s610_s15, 0 }
   0xb   : > { %p888_p4 = por %p56_p2, %p55_p1  ;;  %s43_s20 = ssub.s32 %s822_s13, %s1129_s17 }
   0xc   : > { %p117_p6 = scmp.eq.s32.totalorder %s610_s15, 1  ;;  %p46_p7 = scmp.eq.s32.totalorder %s43_s20, 0 }
   0xd   : > { %p894_p8 = por %p62_p5, %p61_p3  ;;  %p123_p10 = scmp.eq.s32.totalorder %s611_s16, 1 }
   0xe   : > { %p898_p9 = por %p117_p6, %p55_p1  ;;  %p643_p13 = scmp.lt.s32.totalorder %s826_s14, 2 }
   0xf   : > { %s903_s23 = scalar_select %p46_p7, %s814_s11, %s48_s18  }
  0x10   : > { %s1111_s22 = scalar_select %p898_p9, 1, 0 }
  0x11   : > { %p905_p11 = por %p123_p10, %p61_p3  ;;  %s143_s25 = sand.u32 1, %s814_s11  }
  0x12   : > { %s614_s26 = sshll.u32 %s143_s25, 3  ;;  %s630_s27 = sshll.u32 %s822_s13, 7 }
  0x13   : > { %s1112_s24 = scalar_select %p905_p11, 1, 0 }
  0x14   : > { %s916_s30 = scalar_lea.hbm %s1105_s0, %s630_s27  ;;  %s147_s3 = scalar_lea.vmem [#allocation6], %s614_s26 }
  0x15   : > { %s158_s4 = sshll.u32 %s147_s3, 4  ;;  %p922_p0 = pnand %p643_p13, %p888_p4  ;;  %s918_s4 = int_to_ptr.vmem [resolvable:$true] %s158_s4 }
  0x16   : > { %s144_s6 = scalar_lea.sflag [#allocation7], %s143_s25  ;;  %s714_s7 = scalar_lea.hbm %s916_s30, 128 }
  0x17   : > { %p715_p3 = scmp.ne.s32.totalorder %s916_s30, %s714_s7  ;;  %p716_p5 = pneg %p922_p0 }
  0x18   : > { %s719_s16 = scalar_lea.hbm %s1105_s0, 256  ;;  %p720_p4 = scmp.lt.u32.totalorder %s916_s30, %s1105_s0 }
  0x19   : > { %p717_p6 = pnand %p716_p5, %p715_p3  ;;  %p721_p10 = scmp.lt.u32.totalorder %s719_s16, %s714_s7 }
  0x1a   : > { %p723_p12 = scmp.lt.u32.totalorder %s714_s7, %s916_s30 }
  0x1b   : > { %p718_p7 = pneg %p717_p6  ;;  %p722_p13 = por %p721_p10, %p720_p4 }
  0x1d   : > { %p724_p1 = por %p723_p12, %p722_p13 }
  0x1f   : > { %p725_p2 = pnand %p724_p1, %p718_p7 }
  0x21   : > { %728 = shalt.err (!%p725_p2)
}
  0x22   : > { %s729_s20 = scalar_lea.vmem %s918_s4, 128  ;;  %s828_s25 = smov [#allocation6]  }
  0x23   : > { %p730_p3 = scmp.ne.s32.totalorder %s918_s4, %s729_s20  ;;  %s734_s26 = sshll.u32 %s828_s25, 4  ;;  %s735_s26 = int_to_ptr.vmem [resolvable:$false] %s734_s26 }
  0x24   : > { %s736_s27 = scalar_lea.vmem %s735_s26, 256  ;;  %p737_p9 = scmp.lt.s32.totalorder %s918_s4, %s735_s26 }
  0x25   : > { %p732_p6 = pnand %p730_p3, %p716_p5  ;;  %p738_p4 = scmp.lt.s32.totalorder %s736_s27, %s729_s20 }
  0x27   : > { %p733_p11 = pneg %p732_p6  ;;  %p739_p10 = por %p738_p4, %p737_p9 }
  0x29   : > { %p740_p12 = pnand %p739_p10, %p733_p11 }
  0x2b   : > { %743 = shalt.err (!%p740_p12)
}
  0x2c   : > { %638 = dma.hbm_to_vmem [thread:$0]  (!%p922_p0), %s916_s30, 128, %s918_s4, %s144_s6  }
  0x2d   : > { %p1114_p1 = scmp.lt.s32.totalorder %s826_s14, 3  ;;  %p1115_p2 = scmp.ge.s32.totalorder %s826_s14, 1 }
  0x2f   : > { %p178_p5 = pnand %p1115_p2, %p1114_p1 }
  0x30   : > { %s958_s28 = sand.u32 (!%p178_p5), 1, %s810_s10  }
  0x31   : > { %181 = sbr.rel (%p178_p5) target bundleno = 455 (0x1c7), region = 28  ;;  %s618_s29 = sshll.u32 (!%p178_p5), %s958_s28, 3 }
  0x32   : > { %s184_s3 = scalar_lea.sflag (!%p178_p5), [#allocation7], %s958_s28  ;;  %s187_s5 = scalar_lea.vmem (!%p178_p5), [#allocation6], %s618_s29 }
  0x38   : > { %797 = dma.done.wait (%p894_p8), %s184_s3, 128  }
  0x39   : > { %799 = vsyncadd (%p894_p8), %s184_s3, 4294967168  ;;  %p221_p9 = scmp.lt.s32.totalorder %s818_s12, 1  ;;  %v282_v0 = vlaneseq  ;;  %vm236_vm0 = vcmask 1043456   ;;  %v230_v4 = vld [vmem:[%s187_s5] sm:$0xff]  ;;  %v829_v25 = vmov 0.0   ;;  %v830_v20 = vmov 0  }
  0x3a   : > { %v234_v7 = vcombine.high %v230_v4, %v230_v4  ;;  %v237_v8 = vsel %vm236_vm0, %v230_v4, -inf  ;;  %695 = vset.pattern.permute.xlu1 %v830_v20  ;;  %696 = vset.pattern.permute.xlu0 %v830_v20  ;;  %vm406_vm5 = vcmask 3072   ;;  %vm372_vm6 = vcmask 1040384   ;;  %s627_s21 = sshll.u32 %s818_s12, 7  ;;  %s216_s15 = scalar_lea.vmem [#allocation9], %s618_s29 }
  0x3b   : > { %s222_s30 = scalar_select %p221_p9, %s818_s12, 1  ;;  %v971_v1 = vshrl.u32 %v282_v0, 7  ;;  %v238_v9 = vrot.slane %v237_v8, 4  ;;  %vm374_vm7 = vcmask 1041408   ;;  %vm376_vm8 = vcmask 1042432  }
  0x3c   : > { %v244_v10 = vsel %vm236_vm0, %v234_v7, -inf  ;;  %vm487_vm11 = vcmask 1044480   ;;  %vm489_vm12 = vcmask 1045504   ;;  %s509_s16 = sshll.u32 %s216_s15, 4  ;;  %vm491_vm13 = vcmask 1046528   ;;  %s1056_s20 = scalar_lea.hbm %s1107_s2, %s627_s21  ;;  %s1058_s16 = int_to_ptr.vmem [resolvable:$true] %s509_s16 }
  0x3d   : > { %s620_s4 = sshll.u32 %s222_s30, 1  ;;  %v286_v2 = vsub.s32 0, %v971_v1  ;;  %v290_v3 = vsub.s32 4, %v971_v1  ;;  %v239_v13 = vmax.f32 %v237_v8, %v238_v9  ;;  %v245_v14 = vrot.slane %v244_v10, 4  ;;  %s495_s12 = scalar_lea.sflag [#allocation8], %s958_s28 }
  0x3e   : > { %s227_s8 = scalar_lea.vmem %s1106_s1, %s620_s4  ;;  %s744_s25 = scalar_lea.vmem %s1058_s16, 128 }
  0x3f   : > { %v231_v5 = vld [vmem:[%s227_s8] sm:$0x3]  ;;  %v240_v17 = vrot.slane %v239_v13, 2  ;;  %v246_v18 = vmax.f32 %v244_v10, %v245_v14  ;;  %p745_p8 = scmp.ne.s32.totalorder %s1058_s16, %s744_s25  ;;  %p1120_p11 = scmp.ne.s32.totalorder %s1111_s22, 0 }
  0x40   : > { %v232_v6 = vunpack.c.0.s8 %v231_v5  ;;  %s831_s26 = smov [#allocation9]  }
  0x41   : > { %v241_v21 = vmax.f32 %v239_v13, %v240_v17  ;;  %v247_v22 = vrot.slane %v246_v18, 2  ;;  %p746_p0 = pnand %p745_p8, %p1120_p11  ;;  %s748_s27 = sshll.u32 %s831_s26, 4  ;;  %s749_s27 = int_to_ptr.vmem [resolvable:$false] %s748_s27 }
  0x42   : > { %v287_v11 = vrot.slane %v232_v6, %v286_v2  ;;  %v291_v12 = vrot.slane %v232_v6, %v290_v3  ;;  %s750_s29 = scalar_lea.vmem %s749_s27, 256  ;;  %p751_p13 = scmp.lt.s32.totalorder %s1058_s16, %s749_s27 }
  0x43   : > { %v242_v30 = vrot.slane %v241_v21, 1  ;;  %v248_v31 = vmax.f32 %v246_v18, %v247_v22  ;;  %p747_p7 = pneg %p746_p0  ;;  %p752_p3 = scmp.lt.s32.totalorder %s750_s29, %s744_s25 }
  0x44   : > { %v295_v15 = vrot.slane %v287_v11, %v286_v2  ;;  %v299_v16 = vrot.slane %v291_v12, %v286_v2 }
  0x45   : > { %v1004_v37 = vmax.f32 %v241_v21, %v242_v30  ;;  %v249_v38 = vrot.slane %v248_v31, 1  ;;  %p753_p6 = por %p752_p3, %p751_p13 }
  0x46   : > { %vm981_vm1 = vcmp.eq.s32.totalorder %v971_v1, %v295_v15  ;;  %vm986_vm2 = vcmp.eq.s32.totalorder %v971_v1, %v299_v16 }
  0x47   : > { %v302_v23 = vsel %vm981_vm1, %v230_v4, 0.0  ;;  %v303_v24 = vsel %vm986_vm2, %v234_v7, 0.0  ;;  %v623_v26 = vsel %vm981_vm1, 1.0, %v829_v25  ;;  %v624_v27 = vsel %vm986_vm2, 1.0, %v829_v25  ;;  %p754_p4 = pnand %p753_p6, %p747_p7 }
  0x48   : > { %v304_v28 = vsel %vm236_vm0, %v302_v23, 0.0  ;;  %v311_v29 = vsel %vm236_vm0, %v303_v24, 0.0  ;;  %v397_v32 = vsel %vm236_vm0, %v623_v26, 0.0  ;;  %v398_v33 = vsel %vm236_vm0, %v624_v27, 0.0 }
  0x49   : > { %v399_v34 = vadd.f32 %v398_v33, %v397_v32  ;;  %v305_v35 = vrot.slane %v304_v28, 4  ;;  %v312_v36 = vrot.slane %v311_v29, 4  ;;  %v1006_v41 = vmax.f32 %v248_v31, %v249_v38 }
  0x4b   : > { %400 = vadd.xlane.f32.xlu1 %v399_v34  ;;  %v306_v39 = vadd.f32 %v305_v35, %v304_v28  ;;  %v313_v40 = vadd.f32 %v312_v36, %v311_v29  ;;  %v253_v44 = vcombine.low %v1004_v37, %v1006_v41 }
  0x4d   : > { %v307_v42 = vrot.slane %v306_v39, 2  ;;  %v314_v43 = vrot.slane %v313_v40, 2  ;;  %v255_v47 = vsub.f32 %v230_v4, %v253_v44 }
  0x4f   : > { %v308_v45 = vadd.f32 %v307_v42, %v306_v39  ;;  %v315_v46 = vadd.f32 %v314_v43, %v313_v40  ;;  %v256_v50 = vmul.f32 1.442695, %v255_v47 }
  0x51   : > { %v309_v48 = vrot.slane %v308_v45, 1  ;;  %v316_v49 = vrot.slane %v315_v46, 1  ;;  %698 = vpow2.f32 %v256_v50 }
  0x53   : > { %v1010_v51 = vadd.f32 %v309_v48, %v308_v45  ;;  %v317_v52 = vadd.f32 %v316_v49, %v315_v46 }
  0x55   : > { %vm344_vm3 = vcmp.eq.f32.partialorder %v1010_v51, %v1004_v37  ;;  %vm345_vm4 = vcmp.eq.f32.partialorder %v317_v52, %v1006_v41 }
  0x56   : > { %v621_v53 = vsel %vm344_vm3, 1.0, %v829_v25  ;;  %v622_v54 = vsel %vm345_vm4, 1.0, %v829_v25 }
  0x57   : > { %v1017_v55 = vadd.f32 %v622_v54, %v621_v53 }
  0x5b   : > { %v699_v56 = vpop.eup %698 }
  0x5c   : > { %v259_v57 = vcombine.high %v699_v56, %v699_v56  ;;  %v261_v58 = vsel %vm236_vm0, %v699_v56, 0.0  ;;  %v318_v59 = vsel %vm981_vm1, %v699_v56, 0.0 }
  0x5d   : > { %v262_v60 = vrot.slane %v261_v58, 4  ;;  %v320_v61 = vsel %vm236_vm0, %v318_v59, 0.0 }
  0x5e   : > { %v268_v62 = vsel %vm236_vm0, %v259_v57, 0.0  ;;  %v319_v63 = vsel %vm986_vm2, %v259_v57, 0.0  ;;  %v321_v4 = vrot.slane %v320_v61, 4 }
  0x5f   : > { %v263_v2 = vadd.f32 %v262_v60, %v261_v58  ;;  %v269_v3 = vrot.slane %v268_v62, 4  ;;  %v327_v5 = vsel %vm236_vm0, %v319_v63, 0.0 }
  0x60   : > { %v328_v6 = vrot.slane %v327_v5, 4  ;;  %v322_v11 = vadd.f32 %v321_v4, %v320_v61 }
  0x61   : > { %v264_v7 = vrot.slane %v263_v2, 2  ;;  %v270_v8 = vadd.f32 %v269_v3, %v268_v62 }
  0x62   : > { %v329_v12 = vadd.f32 %v328_v6, %v327_v5  ;;  %v323_v17 = vrot.slane %v322_v11, 2 }
  0x63   : > { %v265_v9 = vadd.f32 %v264_v7, %v263_v2  ;;  %v271_v10 = vrot.slane %v270_v8, 2 }
  0x64   : > { %v330_v18 = vrot.slane %v329_v12, 2  ;;  %v324_v22 = vadd.f32 %v323_v17, %v322_v11 }
  0x65   : > { %v266_v13 = vrot.slane %v265_v9, 1  ;;  %v272_v14 = vadd.f32 %v271_v10, %v270_v8 }
  0x66   : > { %v331_v23 = vadd.f32 %v330_v18, %v329_v12  ;;  %v325_v24 = vrot.slane %v324_v22, 1 }
  0x67   : > { %v267_v15 = vadd.f32 %v266_v13, %v265_v9  ;;  %v273_v16 = vrot.slane %v272_v14, 1 }
  0x68   : > { %v332_v26 = vrot.slane %v331_v23, 1  ;;  %v326_v28 = vadd.f32 %v325_v24, %v324_v22 }
  0x69   : > { %v274_v21 = vadd.f32 %v273_v16, %v272_v14  ;;  %700 = vrcp.f32 %v267_v15  ;;  %v432_v16 = vand.u32 127, %v282_v0 }
  0x6a   : > { %702 = vlog2.f32 %v267_v15  ;;  %v333_v30 = vadd.f32 %v332_v26, %v331_v23 }
  0x6b   : > { %704 = vrcp.f32 %v274_v21  ;;  %vm433_vm9 = vcmp.eq.s32.totalorder %v432_v16, %v971_v1  ;;  %vm478_vm10 = vcmp.eq.s32.totalorder %v432_v16, 0 }
  0x6c   : > { %706 = vlog2.f32 %v274_v21  ;;  %v625_v17 = vsel %vm433_vm9, 1.0, %v829_v25 }
  0x73   : > { %v701_v27 = vpop.eup %700 }
  0x74   : > { %v703_v29 = vpop.eup %702  ;;  %v334_v38 = vmul.f32 %v701_v27, %v326_v28 }
  0x75   : > { %v705_v31 = vpop.eup %704  ;;  %v337_v32 = vmul.f32 0.6931472, %v703_v29 }
  0x76   : > { %v707_v33 = vpop.eup %706  ;;  %v279_v34 = vcombine.low %v701_v27, %v705_v31  ;;  %v335_v40 = vmul.f32 %v705_v31, %v333_v30  ;;  %v350_v46 = vadd.f32 0.001, %v334_v38 }
  0x77   : > { %v339_v35 = vmul.f32 0.6931472, %v707_v33  ;;  %v340_v36 = vadd.f32 %v337_v32, %v1004_v37 }
  0x78   : > { %v281_v39 = vmul.f32 %v699_v56, %v279_v34  ;;  %v351_v47 = vadd.f32 0.001, %v335_v40  ;;  %v366_v49 = vadd.f32 %v335_v40, %v334_v38 }
  0x79   : > { %v341_v42 = vadd.f32 %v339_v35, %v1006_v41  ;;  %v342_v43 = vsub.f32 %v340_v36, %v1010_v51 }
  0x7a   : > { %v358_v44 = vmul.f32 1.442695, %v281_v39 }
  0x7b   : > { %v343_v45 = vsub.f32 %v341_v42, %v317_v52 }
  0x7c   : > { %708 = vpow2.f32 %v358_v44 }
  0x7d   : > { %v360_v48 = vadd.f32 %v343_v45, %v342_v43  ;;  %710 = vlog2.f32 %v350_v46 }
  0x7e   : > { %712 = vlog2.f32 %v351_v47 }
  0x7f   : > { %361 = vadd.xlane.f32.xlu1 %v360_v48 }
  0x83   : > { %367 = vadd.xlane.f32.xlu1 %v366_v49 }
  0x86   : > { %v709_v50 = vpop.eup %708 }
  0x87   : > { %v379_v37 = vcombine.high %v709_v50, %v709_v50  ;;  %v381_v53 = vsel %vm981_vm1, %v709_v50, 0.0  ;;  %v711_v54 = vpop.eup %710  ;;  %v388_v57 = vsel %vm236_vm0, %v709_v50, 0.0 }
  0x88   : > { %v383_v41 = vsel %vm236_vm0, %v381_v53, 0.0  ;;  %v713_v52 = vpop.eup %712  ;;  %v353_v61 = vmul.f32 0.6931472, %v711_v54 }
  0x89   : > { %v382_v51 = vsel %vm986_vm2, %v379_v37, 0.0  ;;  %v389_v58 = vsel %vm236_vm0, %v379_v37, 0.0  ;;  %v355_v62 = vmul.f32 0.6931472, %v713_v52 }
  0x8a   : > { %v384_v56 = vsel %vm236_vm0, %v382_v51, 0.0  ;;  %v390_v60 = vadd.f32 %v389_v58, %v388_v57  ;;  %v356_v19 = vsub.f32 0.0, %v353_v61 }
  0x8b   : > { %v385_v59 = vadd.f32 %v384_v56, %v383_v41  ;;  %v357_v63 = vsub.f32 0.0, %v355_v62 }
  0x8d   : > { %386 = vadd.xlane.f32.xlu0 %v385_v59  ;;  %v369_v2 = vadd.f32 %v357_v63, %v356_v19 }
  0x91   : > { %391 = vadd.xlane.f32.xlu0 %v390_v60 }
  0x95   : > { %364 = vadd.xlane.f32.xlu0 %v1017_v55 }
  0x99   : > { %370 = vadd.xlane.f32.xlu0 %v369_v2 }
  0xd8   : > { %v401_v3 = vpop.xlane.xlu1 %400 }
  0xd9   : > { %410 = vst.msk [vmem:[#allocation5] sm:$0xf] %vm406_vm5, %v401_v3 }
  0xe0   : > { %v464_v11 = vld [vmem:[#allocation5] sm:$0xf] }
 0x10c   : > { %v362_v5 = vpop.xlane.xlu1 %361 }
 0x110   : > { %v368_v7 = vpop.xlane.xlu1 %367 }
 0x11a   : > { %v387_v4 = vpop.xlane.xlu0 %386 }
 0x11b   : > { %408 = vst.msk [vmem:[#allocation3] sm:$0xf] %vm406_vm5, %v387_v4 }
 0x11e   : > { %v392_v6 = vpop.xlane.xlu0 %391 }
 0x11f   : > { %409 = vst.msk [vmem:[#allocation4] sm:$0xf] %vm406_vm5, %v392_v6 }
 0x122   : > { %v365_v55 = vpop.xlane.xlu0 %364  ;;  %v436_v8 = vld [vmem:[#allocation3] sm:$0xf] }
 0x123   : > { %v373_v9 = vsel %vm372_vm6, %v362_v5, %v365_v55  ;;  %439 = vperm.xlu1 %695, %v436_v8  }
 0x124   : > { %v375_v10 = vsel %vm374_vm7, %v373_v9, %v368_v7 }
 0x126   : > { %v371_v12 = vpop.xlane.xlu0 %370  ;;  %v450_v13 = vld [vmem:[#allocation4] sm:$0xf] }
 0x127   : > { %v377_v14 = vsel %vm376_vm8, %v375_v10, %v371_v12  ;;  %467 = vperm.xlu1 %695, %v464_v11   ;;  %453 = vperm.xlu0 %696, %v450_v13  }
 0x128   : > { %407 = vst.msk [vmem:[#allocation2] sm:$0xf] %vm406_vm5, %v377_v14 }
 0x12f   : > { %v479_v15 = vld [vmem:[#allocation2] sm:$0xf] }
 0x130   : > { %482 = vperm.xlu1 %695, %v479_v15  }
 0x1a2   : > { %v440_v18 = vpop.permute.xlu1 %439 }
 0x1a3   : > { %v442_v21 = vmul.f32 %v625_v17, %v440_v18 }
 0x1a5   : > { %v443_v22 = vsel %vm236_vm0, %v442_v21, 0.0 }
 0x1a6   : > { %v444_v23 = vrot.slane %v443_v22, 4  ;;  %v468_v24 = vpop.permute.xlu1 %467  ;;  %v454_v26 = vpop.permute.xlu0 %453 }
 0x1a7   : > { %v470_v27 = vmul.f32 %v625_v17, %v468_v24  ;;  %v456_v28 = vmul.f32 %v625_v17, %v454_v26 }
 0x1a8   : > { %v445_v29 = vadd.f32 %v444_v23, %v443_v22 }
 0x1a9   : > { %v471_v30 = vsel %vm236_vm0, %v470_v27, 0.0  ;;  %v457_v31 = vsel %vm236_vm0, %v456_v28, 0.0 }
 0x1aa   : > { %v446_v32 = vrot.slane %v445_v29, 2  ;;  %v472_v0 = vrot.slane %v471_v30, 4  ;;  %v458_v33 = vrot.slane %v457_v31, 4 }
 0x1ac   : > { %v447_v1 = vadd.f32 %v446_v32, %v445_v29  ;;  %v473_v34 = vadd.f32 %v472_v0, %v471_v30  ;;  %v459_v25 = vadd.f32 %v458_v33, %v457_v31 }
 0x1ae   : > { %v448_v35 = vrot.slane %v447_v1, 1  ;;  %v474_v36 = vrot.slane %v473_v34, 2  ;;  %v460_v38 = vrot.slane %v459_v25, 2 }
 0x1af   : > { %v483_v39 = vpop.permute.xlu1 %482 }
 0x1b0   : > { %v475_v40 = vadd.f32 %v474_v36, %v473_v34  ;;  %v461_v42 = vadd.f32 %v460_v38, %v459_v25  ;;  %v449_v43 = vadd.f32 %v448_v35, %v447_v1  ;;  %v485_v46 = vsel %vm478_vm10, %v483_v39, 0.0 }
 0x1b2   : > { %v476_v44 = vrot.slane %v475_v40, 1  ;;  %v462_v45 = vrot.slane %v461_v42, 1  ;;  %v486_v49 = vsel %vm236_vm0, %v485_v46, %v449_v43 }
 0x1b4   : > { %v477_v47 = vadd.f32 %v476_v44, %v475_v40  ;;  %v463_v48 = vadd.f32 %v462_v45, %v461_v42 }
 0x1b6   : > { %v488_v50 = vsel %vm487_vm11, %v486_v49, %v463_v48 }
 0x1b7   : > { %v490_v37 = vsel %vm489_vm12, %v488_v50, %v477_v47 }
 0x1b8   : > { %v492_v53 = vsel %vm491_vm13, %v490_v37, 0.0 }
 0x1b9   : > { %493 = vst [vmem:[%s216_s15] sm:$0xff] %v492_v53 }
 0x1ba   : > { %757 = shalt.err (!%p754_p4)
}
 0x1bb   : > { %s758_s28 = scalar_lea.hbm %s1056_s20, 128  ;;  %s762_s30 = scalar_lea.hbm %s1107_s2, 256 }
 0x1bc   : > { %p759_p10 = scmp.ne.s32.totalorder %s1056_s20, %s758_s28  ;;  %p763_p2 = scmp.lt.u32.totalorder %s1056_s20, %s1107_s2 }
 0x1bd   : > { %p764_p5 = scmp.lt.u32.totalorder %s762_s30, %s758_s28  ;;  %p766_p8 = scmp.lt.u32.totalorder %s758_s28, %s1056_s20 }
 0x1be   : > { %p760_p12 = pnand %p759_p10, %p1120_p11 }
 0x1bf   : > { %p765_p9 = por %p764_p5, %p763_p2 }
 0x1c0   : > { %p761_p1 = pneg %p760_p12 }
 0x1c1   : > { %p767_p0 = por %p766_p8, %p765_p9 }
 0x1c3   : > { %p768_p7 = pnand %p767_p0, %p761_p1 }
 0x1c5   : > { %771 = shalt.err (!%p768_p7)
}
 0x1c6   : > { %633 = dma.vmem_to_hbm [thread:$0]  (%p1120_p11), %s1058_s16, 128, %s1056_s20, %s495_s12  }
 0x1c7 PF: > { %s521_s7 = sand.u32 1, %s806_s9   ;;  %p1121_p13 = scmp.ne.s32.totalorder %s1112_s24, 0 }
 0x1c8   : > { %p1122_p3 = scmp.ge.s32.totalorder %s826_s14, 2  ;;  %s522_s8 = scalar_lea.sflag [#allocation8], %s521_s7 }
 0x1ca   : > { %p640_p6 = pnand %p1122_p3, %p1121_p13 }
 0x1cc   : > { %801 = dma.done.wait (!%p640_p6), %s522_s8, 128  }
 0x1cd   : > { %803 = vsyncadd (!%p640_p6), %s522_s8, 4294967168  ;;  %s18_s14 = sadd.s32 1, %s826_s14   ;;  %s1123_s9 = smov %s810_s10 }
 0x1ce   : > { %p15_p4 = scmp.ge.s32.totalorder %s18_s14, 4   ;;  %s1124_s10 = smov %s814_s11 }
 0x1cf   : > { %s1125_s11 = smov %s903_s23  ;;  %s1126_s12 = smov %s822_s13 }
 0x1d0   : > { %s1127_s13 = smov %s1129_s17  ;;  %17 = sbr.rel (!%p15_p4) target bundleno = 6 (0x6), region = 88 }
 0x1d7   :  { %527 = vsyncpa [#allocation7], 1 }
 0x1d8   :  { %529 = vsyncpa [#allocation7 + $0x1], 1 }
 0x1d9   :  { %530 = vsyncpa [#allocation8], 1 }
 0x1da   :  { %532 = vsyncpa [#allocation8 + $0x1], 1 }

// kernel: tpu_custom_call.1
= control target key start
LH: loop header
LB: loop body
LE: loop exit
PB: predicated region body
PF: predicated region fallthrough
CT: control target
= control target key end

     0   :  { %7 = vsyncpa [#allocation7], 0  ;;  %s1197_s0 = inlined_call_operand.hbm [shape: f32[2,4,256], index: 0, kind: input, shape index: {}]   ;;  %s1198_s1 = inlined_call_operand.hbm [shape: s32[2,1,256], index: 1, kind: input, shape index: {}]   ;;  %s1199_s2 = inlined_call_operand.hbm [shape: f32[2,1,8,128], index: 2, kind: output, shape index: {}]  }
   0x1   :  { %9 = vsyncpa [#allocation7 + $0x1], 0 }
   0x2   :  { %10 = vsyncpa [#allocation10], 0 }
   0x3   :  { %12 = vsyncpa [#allocation10 + $0x1], 0 }
   0x4   :  { %13 = vsyncpa [#allocation8], 0 }
   0x5   :  { %15 = vsyncpa [#allocation8 + $0x1], 0  ;;  %s901_s9 = smov 0   ;;  %s903_s10 = smov 0  }
   0x6   :  { %s905_s11 = smov 0   ;;  %s907_s12 = smov 0  }
   0x7   :  { %s909_s13 = smov 0   ;;  %s911_s14 = smov 0  }
   0x8 LB: > { %s620_s15 = sadd.s32 4294967295, %s879_s14   ;;  %s621_s16 = sadd.s32 4294967294, %s879_s14   ;;  %s879_s14 = sphi %s911_s14, %s21_s14   ;;  %s875_s13 = sphi %s909_s13, %s1219_s13   ;;  %s871_s12 = sphi %s907_s12, %s1218_s12   ;;  %s867_s11 = sphi %s905_s11, %s1217_s11   ;;  %s863_s10 = sphi %s903_s10, %s1216_s10   ;;  %s859_s9 = sphi %s901_s9, %s1215_s9  }
   0x9   : > { %s40_s17 = sadd.s32 1, %s875_s13  ;;  %s51_s18 = sadd.s32 1, %s867_s11 }
   0xa   : > { %p42_p0 = scmp.ge.s32.totalorder %s40_s17, 2  ;;  %p58_p1 = scmp.ne.s32.totalorder %s867_s11, %s863_s10 }
   0xb   : > { %p59_p2 = scmp.eq.s32.totalorder %s879_s14, 0  ;;  %p64_p3 = scmp.ne.s32.totalorder %s863_s10, %s859_s9 }
   0xc   : > { %s1221_s17 = smov (%p42_p0, %s40_s17), 0  ;;  %p65_p5 = scmp.eq.s32.totalorder %s620_s15, 0 }
   0xd   : > { %p942_p4 = por %p59_p2, %p58_p1  ;;  %s46_s20 = ssub.s32 %s875_s13, %s1221_s17 }
   0xe   : > { %p120_p6 = scmp.eq.s32.totalorder %s620_s15, 1  ;;  %p49_p7 = scmp.eq.s32.totalorder %s46_s20, 0 }
   0xf   : > { %p948_p8 = por %p65_p5, %p64_p3  ;;  %p126_p10 = scmp.eq.s32.totalorder %s621_s16, 1 }
  0x10   : > { %p952_p9 = por %p120_p6, %p58_p1  ;;  %p662_p13 = scmp.lt.s32.totalorder %s879_s14, 2 }
  0x11   : > { %s1203_s21 = scalar_select %p948_p8, 1, 0 }
  0x12   : > { %s1204_s22 = scalar_select %p952_p9, 1, 0 }
  0x13   : > { %s957_s23 = scalar_select %p49_p7, %s867_s11, %s51_s18  }
  0x14   : > { %p959_p11 = por %p126_p10, %p64_p3  ;;  %s966_s25 = sand.u32 1, %s867_s11  }
  0x15   : > { %s624_s26 = sshll.u32 %s966_s25, 3  ;;  %s643_s27 = sshll.u32 %s875_s13, 7 }
  0x16   : > { %s1205_s24 = scalar_select %p959_p11, 1, 0 }
  0x17   : > { %s973_s30 = scalar_lea.hbm %s1197_s0, %s643_s27  ;;  %s150_s3 = scalar_lea.vmem [#allocation6], %s624_s26 }
  0x18   : > { %s161_s4 = sshll.u32 %s150_s3, 4  ;;  %p979_p0 = pnand %p662_p13, %p942_p4  ;;  %s975_s4 = int_to_ptr.vmem [resolvable:$true] %s161_s4 }
  0x19   : > { %s147_s6 = scalar_lea.sflag [#allocation7], %s966_s25  ;;  %s733_s7 = scalar_lea.hbm %s973_s30, 128 }
  0x1a   : > { %p734_p3 = scmp.ne.s32.totalorder %s973_s30, %s733_s7  ;;  %p735_p5 = pneg %p979_p0 }
  0x1b   : > { %s738_s16 = scalar_lea.hbm %s1197_s0, 256  ;;  %p739_p4 = scmp.lt.u32.totalorder %s973_s30, %s1197_s0 }
  0x1c   : > { %p736_p6 = pnand %p735_p5, %p734_p3  ;;  %p740_p10 = scmp.lt.u32.totalorder %s738_s16, %s733_s7 }
  0x1d   : > { %p742_p12 = scmp.lt.u32.totalorder %s733_s7, %s973_s30 }
  0x1e   : > { %p737_p7 = pneg %p736_p6  ;;  %p741_p13 = por %p740_p10, %p739_p4 }
  0x20   : > { %p743_p1 = por %p742_p12, %p741_p13 }
  0x22   : > { %p744_p2 = pnand %p743_p1, %p737_p7 }
  0x24   : > { %747 = shalt.err (!%p744_p2)
}
  0x25   : > { %s748_s20 = scalar_lea.vmem %s975_s4, 128  ;;  %s881_s26 = smov [#allocation6]  }
  0x26   : > { %p749_p3 = scmp.ne.s32.totalorder %s975_s4, %s748_s20  ;;  %s753_s27 = sshll.u32 %s881_s26, 4  ;;  %s754_s27 = int_to_ptr.vmem [resolvable:$false] %s753_s27 }
  0x27   : > { %s755_s28 = scalar_lea.vmem %s754_s27, 256  ;;  %p756_p9 = scmp.lt.s32.totalorder %s975_s4, %s754_s27 }
  0x28   : > { %p751_p6 = pnand %p749_p3, %p735_p5  ;;  %p757_p4 = scmp.lt.s32.totalorder %s755_s28, %s748_s20 }
  0x2a   : > { %p752_p11 = pneg %p751_p6  ;;  %p758_p10 = por %p757_p4, %p756_p9 }
  0x2c   : > { %p759_p12 = pnand %p758_p10, %p752_p11 }
  0x2e   : > { %762 = shalt.err (!%p759_p12)
}
  0x2f   : > { %654 = dma.hbm_to_vmem [thread:$0]  (!%p979_p0), %s973_s30, 128, %s975_s4, %s147_s6  }
  0x30   : > { %p1207_p1 = scmp.lt.s32.totalorder %s879_s14, 3  ;;  %p1208_p2 = scmp.ge.s32.totalorder %s879_s14, 1 }
  0x31   : > { %s627_s3 = sshll.u32 %s966_s25, 1  ;;  %s644_s7 = sshll.u32 %s875_s13, 5 }
  0x32   : > { %p1015_p7 = pnand %p1208_p2, %p1207_p1  ;;  %s1024_s16 = scalar_lea.hbm %s1198_s1, %s644_s7 }
  0x33   : > { %s172_s18 = scalar_lea.vmem [#allocation9], %s627_s3  ;;  %s169_s30 = scalar_lea.sflag [#allocation10], %s966_s25 }
  0x34   : > { %s1209_s29 = scalar_select %p1015_p7, 1, 0 }
  0x35   : > { %s183_s19 = sshll.u32 %s172_s18, 4  ;;  %s763_s4 = scalar_lea.hbm %s1024_s16, 32  ;;  %s184_s19 = int_to_ptr.vmem [resolvable:$true] %s183_s19 }
  0x36   : > { %p764_p9 = scmp.ne.s32.totalorder %s1024_s16, %s763_s4  ;;  %s768_s26 = scalar_lea.hbm %s1198_s1, 64 }
  0x37   : > { %p769_p3 = scmp.lt.u32.totalorder %s1024_s16, %s1198_s1  ;;  %p770_p6 = scmp.lt.u32.totalorder %s768_s26, %s763_s4 }
  0x38   : > { %p766_p11 = pnand %p764_p9, %p735_p5  ;;  %p772_p10 = scmp.lt.u32.totalorder %s763_s4, %s1024_s16 }
  0x39   : > { %p771_p4 = por %p770_p6, %p769_p3 }
  0x3a   : > { %p767_p13 = pneg %p766_p11 }
  0x3b   : > { %p773_p12 = por %p772_p10, %p771_p4 }
  0x3d   : > { %p774_p1 = pnand %p773_p12, %p767_p13 }
  0x3f   : > { %777 = shalt.err (!%p774_p1)
}
  0x40   : > { %s778_s25 = scalar_lea.vmem %s184_s19, 32  ;;  %s882_s3 = smov [#allocation9]  }
  0x41   : > { %p779_p2 = scmp.ne.s32.totalorder %s184_s19, %s778_s25  ;;  %s783_s7 = sshll.u32 %s882_s3, 4  ;;  %s784_s7 = int_to_ptr.vmem [resolvable:$false] %s783_s7 }
  0x42   : > { %s785_s8 = scalar_lea.vmem %s784_s7, 64  ;;  %p786_p8 = scmp.lt.s32.totalorder %s184_s19, %s784_s7 }
  0x43   : > { %p781_p9 = pnand %p779_p2, %p735_p5  ;;  %p787_p7 = scmp.lt.s32.totalorder %s785_s8, %s778_s25 }
  0x45   : > { %p782_p11 = pneg %p781_p9  ;;  %p788_p3 = por %p787_p7, %p786_p8 }
  0x47   : > { %p789_p6 = pnand %p788_p3, %p782_p11 }
  0x49   : > { %792 = shalt.err (!%p789_p6)
}
  0x4a   : > { %657 = dma.hbm_to_vmem [thread:$0]  (!%p979_p0), %s1024_s16, 32, %s184_s19, %s169_s30  }
  0x4b   : > { %p1210_p13 = scmp.ne.s32.totalorder %s1209_s29, 0 }
  0x4c   : > { %s1049_s15 = sand.u32 (!%p1210_p13), 1, %s863_s10   ;;  %p1211_p8 = scmp.ne.s32.totalorder (!%p1210_p13), %s1203_s21, 0 }
  0x4d   : > { %192 = sbr.rel (%p1210_p13) target bundleno = 486 (0x1e6), region = 28  ;;  %s631_s18 = sshll.u32 (!%p1210_p13), %s1049_s15, 3 }
  0x4e   : > { %s195_s4 = scalar_lea.sflag (!%p1210_p13), [#allocation7], %s1049_s15  ;;  %s198_s6 = scalar_lea.vmem (!%p1210_p13), [#allocation6], %s631_s18 }
  0x54   : > { %846 = dma.done.wait (%p1211_p8), %s195_s4, 128  }
  0x55   : > { %848 = vsyncadd (%p1211_p8), %s195_s4, 4294967168  ;;  %s632_s5 = sshll.u32 %s1049_s15, 1  ;;  %s204_s29 = scalar_lea.sflag [#allocation10], %s1049_s15 }
  0x56   : > { %s207_s16 = scalar_lea.vmem [#allocation9], %s632_s5 }
  0x57   : > { %850 = dma.done.wait (%p1211_p8), %s204_s29, 32  }
  0x58   : > { %852 = vsyncadd (%p1211_p8), %s204_s29, 4294967264  ;;  %v288_v0 = vlaneseq  ;;  %vm242_vm0 = vcmask 1043456   ;;  %v237_v4 = vld [vmem:[%s198_s6] sm:$0xff]  ;;  %v238_v5 = vld [vmem:[%s207_s16] sm:$0x3]  ;;  %v883_v16 = vmov 0.0  }
  0x59   : > { %v240_v6 = vcombine.high %v237_v4, %v237_v4  ;;  %v243_v7 = vsel %vm242_vm0, %v237_v4, -inf  ;;  %vm404_vm5 = vcmask 3072   ;;  %vm370_vm6 = vcmask 1040384   ;;  %s640_s21 = sshll.u32 %s871_s12, 7  ;;  %s232_s19 = scalar_lea.vmem [#allocation11], %s631_s18 }
  0x5a   : > { %v1066_v1 = vshrl.u32 %v288_v0, 7  ;;  %v244_v10 = vrot.slane %v243_v7, 4  ;;  %vm372_vm7 = vcmask 1041408   ;;  %vm374_vm8 = vcmask 1042432   ;;  %s507_s30 = sshll.u32 %s232_s19, 4  ;;  %s1148_s27 = scalar_lea.hbm %s1199_s2, %s640_s21  ;;  %s1150_s30 = int_to_ptr.vmem [resolvable:$true] %s507_s30 }
  0x5b   : > { %v250_v11 = vsel %vm242_vm0, %v240_v6, -inf  ;;  %vm485_vm11 = vcmask 1044480   ;;  %vm487_vm12 = vcmask 1045504   ;;  %vm489_vm13 = vcmask 1046528   ;;  %s493_s12 = scalar_lea.sflag [#allocation8], %s1049_s15  ;;  %s793_s28 = scalar_lea.vmem %s1150_s30, 128 }
  0x5c   : > { %v292_v2 = vsub.s32 0, %v1066_v1  ;;  %v296_v3 = vsub.s32 1, %v1066_v1  ;;  %v245_v12 = vmax.f32 %v243_v7, %v244_v10  ;;  %v251_v13 = vrot.slane %v250_v11, 4  ;;  %p794_p0 = scmp.ne.s32.totalorder %s1150_s30, %s793_s28  ;;  %p1212_p5 = scmp.ne.s32.totalorder %s1204_s22, 0 }
  0x5d   : > { %s885_s25 = smov [#allocation11]  }
  0x5e   : > { %v1071_v8 = vrot.slane %v238_v5, %v292_v2  ;;  %v1073_v9 = vrot.slane %v238_v5, %v296_v3  ;;  %v246_v21 = vrot.slane %v245_v12, 2  ;;  %v252_v22 = vmax.f32 %v250_v11, %v251_v13  ;;  %p795_p7 = pnand %p794_p0, %p1212_p5  ;;  %s797_s3 = sshll.u32 %s885_s25, 4  ;;  %s798_s3 = int_to_ptr.vmem [resolvable:$false] %s797_s3 }
  0x5f   : > { %s799_s7 = scalar_lea.vmem %s798_s3, 256  ;;  %p800_p10 = scmp.lt.s32.totalorder %s1150_s30, %s798_s3 }
  0x60   : > { %vm298_vm1 = vcmp.eq.s32.totalorder %v1066_v1, %v1071_v8  ;;  %vm299_vm2 = vcmp.eq.s32.totalorder %v1066_v1, %v1073_v9  ;;  %v247_v28 = vmax.f32 %v245_v12, %v246_v21  ;;  %v253_v29 = vrot.slane %v252_v22, 2  ;;  %p796_p4 = pneg %p795_p7  ;;  %p801_p12 = scmp.lt.s32.totalorder %s799_s7, %s793_s28 }
  0x61   : > { %v300_v14 = vsel %vm298_vm1, %v237_v4, 0.0  ;;  %v301_v15 = vsel %vm299_vm2, %v240_v6, 0.0  ;;  %v636_v17 = vsel %vm298_vm1, 1.0, %v883_v16  ;;  %v637_v18 = vsel %vm299_vm2, 1.0, %v883_v16 }
  0x62   : > { %v302_v19 = vsel %vm242_vm0, %v300_v14, 0.0  ;;  %v309_v20 = vsel %vm242_vm0, %v301_v15, 0.0  ;;  %v395_v23 = vsel %vm242_vm0, %v636_v17, 0.0  ;;  %v396_v24 = vsel %vm242_vm0, %v637_v18, 0.0  ;;  %p802_p1 = por %p801_p12, %p800_p10 }
  0x63   : > { %v397_v25 = vadd.f32 %v396_v24, %v395_v23  ;;  %v303_v26 = vrot.slane %v302_v19, 4  ;;  %v310_v27 = vrot.slane %v309_v20, 4  ;;  %v248_v32 = vrot.slane %v247_v28, 1 }
  0x64   : > { %v254_v33 = vmax.f32 %v252_v22, %v253_v29  ;;  %v884_v9 = vmov 0   ;;  %p803_p2 = pnand %p802_p1, %p796_p4 }
  0x65   : > { %398 = vadd.xlane.f32.xlu1 %v397_v25  ;;  %v304_v30 = vadd.f32 %v303_v26, %v302_v19  ;;  %v311_v31 = vadd.f32 %v310_v27, %v309_v20  ;;  %v249_v36 = vmax.f32 %v247_v28, %v248_v32  ;;  %715 = vset.pattern.permute.xlu0 %v884_v9 }
  0x66   : > { %v255_v37 = vrot.slane %v254_v33, 1  ;;  %714 = vset.pattern.permute.xlu1 %v884_v9 }
  0x67   : > { %v305_v34 = vrot.slane %v304_v30, 2  ;;  %v312_v35 = vrot.slane %v311_v31, 2 }
  0x68   : > { %v256_v40 = vmax.f32 %v254_v33, %v255_v37 }
  0x69   : > { %v306_v38 = vadd.f32 %v305_v34, %v304_v30  ;;  %v313_v39 = vadd.f32 %v312_v35, %v311_v31 }
  0x6a   : > { %v259_v43 = vcombine.low %v249_v36, %v256_v40 }
  0x6b   : > { %v307_v41 = vrot.slane %v306_v38, 1  ;;  %v314_v42 = vrot.slane %v313_v39, 1 }
  0x6c   : > { %v261_v46 = vsub.f32 %v237_v4, %v259_v43 }
  0x6d   : > { %v1098_v44 = vadd.f32 %v307_v41, %v306_v38  ;;  %v1100_v45 = vadd.f32 %v314_v42, %v313_v39 }
  0x6e   : > { %v262_v47 = vmul.f32 1.442695, %v261_v46 }
  0x6f   : > { %vm342_vm3 = vcmp.eq.f32.partialorder %v1098_v44, %v249_v36  ;;  %vm343_vm4 = vcmp.eq.f32.partialorder %v1100_v45, %v256_v40 }
  0x70   : > { %v634_v48 = vsel %vm342_vm3, 1.0, %v883_v16  ;;  %v635_v49 = vsel %vm343_vm4, 1.0, %v883_v16  ;;  %717 = vpow2.f32 %v262_v47 }
  0x71   : > { %v1106_v50 = vadd.f32 %v635_v49, %v634_v48 }
  0x7a   : > { %v718_v51 = vpop.eup %717 }
  0x7b   : > { %v265_v52 = vcombine.high %v718_v51, %v718_v51  ;;  %v267_v53 = vsel %vm242_vm0, %v718_v51, 0.0  ;;  %v316_v54 = vsel %vm298_vm1, %v718_v51, 0.0 }
  0x7c   : > { %v268_v55 = vrot.slane %v267_v53, 4  ;;  %v318_v56 = vsel %vm242_vm0, %v316_v54, 0.0 }
  0x7d   : > { %v274_v57 = vsel %vm242_vm0, %v265_v52, 0.0  ;;  %v317_v58 = vsel %vm299_vm2, %v265_v52, 0.0  ;;  %v319_v61 = vrot.slane %v318_v56, 4 }
  0x7e   : > { %v269_v59 = vadd.f32 %v268_v55, %v267_v53  ;;  %v275_v60 = vrot.slane %v274_v57, 4  ;;  %v325_v62 = vsel %vm242_vm0, %v317_v58, 0.0 }
  0x7f   : > { %v326_v63 = vrot.slane %v325_v62, 4  ;;  %v320_v6 = vadd.f32 %v319_v61, %v318_v56 }
  0x80   : > { %v270_v2 = vrot.slane %v269_v59, 2  ;;  %v276_v3 = vadd.f32 %v275_v60, %v274_v57 }
  0x81   : > { %v327_v7 = vadd.f32 %v326_v63, %v325_v62  ;;  %v321_v14 = vrot.slane %v320_v6, 2 }
  0x82   : > { %v271_v4 = vadd.f32 %v270_v2, %v269_v59  ;;  %v277_v5 = vrot.slane %v276_v3, 2 }
  0x83   : > { %v328_v15 = vrot.slane %v327_v7, 2  ;;  %v322_v18 = vadd.f32 %v321_v14, %v320_v6 }
  0x84   : > { %v272_v10 = vrot.slane %v271_v4, 1  ;;  %v278_v11 = vadd.f32 %v277_v5, %v276_v3 }
  0x85   : > { %v329_v19 = vadd.f32 %v328_v15, %v327_v7  ;;  %v323_v20 = vrot.slane %v322_v18, 1 }
  0x86   : > { %v273_v12 = vadd.f32 %v272_v10, %v271_v4  ;;  %v279_v13 = vrot.slane %v278_v11, 1 }
  0x87   : > { %v330_v21 = vrot.slane %v329_v19, 1  ;;  %v324_v23 = vadd.f32 %v323_v20, %v322_v18 }
  0x88   : > { %v280_v17 = vadd.f32 %v279_v13, %v278_v11  ;;  %719 = vrcp.f32 %v273_v12  ;;  %v430_v13 = vand.u32 127, %v288_v0 }
  0x89   : > { %721 = vlog2.f32 %v273_v12  ;;  %v331_v25 = vadd.f32 %v330_v21, %v329_v19 }
  0x8a   : > { %723 = vrcp.f32 %v280_v17  ;;  %vm431_vm9 = vcmp.eq.s32.totalorder %v430_v13, %v1066_v1  ;;  %vm476_vm10 = vcmp.eq.s32.totalorder %v430_v13, 0 }
  0x8b   : > { %725 = vlog2.f32 %v280_v17  ;;  %v638_v14 = vsel %vm431_vm9, 1.0, %v883_v16 }
  0x92   : > { %v720_v22 = vpop.eup %719 }
  0x93   : > { %v722_v24 = vpop.eup %721  ;;  %v332_v32 = vmul.f32 %v720_v22, %v324_v23 }
  0x94   : > { %v724_v26 = vpop.eup %723  ;;  %v335_v27 = vmul.f32 0.6931472, %v722_v24 }
  0x95   : > { %v726_v28 = vpop.eup %725  ;;  %v285_v29 = vcombine.low %v720_v22, %v724_v26  ;;  %v333_v34 = vmul.f32 %v724_v26, %v331_v25  ;;  %v348_v41 = vadd.f32 0.001, %v332_v32 }
  0x96   : > { %v337_v30 = vmul.f32 0.6931472, %v726_v28  ;;  %v338_v31 = vadd.f32 %v335_v27, %v249_v36 }
  0x97   : > { %v287_v33 = vmul.f32 %v718_v51, %v285_v29  ;;  %v349_v42 = vadd.f32 0.001, %v333_v34  ;;  %v364_v46 = vadd.f32 %v333_v34, %v332_v32 }
  0x98   : > { %v339_v35 = vadd.f32 %v337_v30, %v256_v40  ;;  %v340_v37 = vsub.f32 %v338_v31, %v1098_v44 }
  0x99   : > { %v356_v38 = vmul.f32 1.442695, %v287_v33 }
  0x9a   : > { %v341_v39 = vsub.f32 %v339_v35, %v1100_v45 }
  0x9b   : > { %727 = vpow2.f32 %v356_v38 }
  0x9c   : > { %v358_v43 = vadd.f32 %v341_v39, %v340_v37  ;;  %729 = vlog2.f32 %v348_v41 }
  0x9d   : > { %731 = vlog2.f32 %v349_v42 }
  0x9e   : > { %359 = vadd.xlane.f32.xlu1 %v358_v43 }
  0xa2   : > { %365 = vadd.xlane.f32.xlu1 %v364_v46 }
  0xa5   : > { %v728_v47 = vpop.eup %727 }
  0xa6   : > { %v377_v36 = vcombine.high %v728_v47, %v728_v47  ;;  %v379_v40 = vsel %vm298_vm1, %v728_v47, 0.0  ;;  %v730_v48 = vpop.eup %729  ;;  %v386_v52 = vsel %vm242_vm0, %v728_v47, 0.0 }
  0xa7   : > { %v381_v44 = vsel %vm242_vm0, %v379_v40, 0.0  ;;  %v732_v49 = vpop.eup %731  ;;  %v351_v56 = vmul.f32 0.6931472, %v730_v48 }
  0xa8   : > { %v380_v45 = vsel %vm299_vm2, %v377_v36, 0.0  ;;  %v387_v53 = vsel %vm242_vm0, %v377_v36, 0.0  ;;  %v353_v8 = vmul.f32 0.6931472, %v732_v49 }
  0xa9   : > { %v382_v51 = vsel %vm242_vm0, %v380_v45, 0.0  ;;  %v388_v55 = vadd.f32 %v387_v53, %v386_v52  ;;  %v354_v57 = vsub.f32 0.0, %v351_v56 }
  0xaa   : > { %v383_v54 = vadd.f32 %v382_v51, %v381_v44  ;;  %v355_v58 = vsub.f32 0.0, %v353_v8 }
  0xac   : > { %384 = vadd.xlane.f32.xlu0 %v383_v54  ;;  %v367_v59 = vadd.f32 %v355_v58, %v354_v57 }
  0xb0   : > { %389 = vadd.xlane.f32.xlu0 %v388_v55 }
  0xb4   : > { %362 = vadd.xlane.f32.xlu0 %v1106_v50 }
  0xb8   : > { %368 = vadd.xlane.f32.xlu0 %v367_v59 }
  0xf2   : > { %v399_v60 = vpop.xlane.xlu1 %398 }
  0xf3   : > { %408 = vst.msk [vmem:[#allocation5] sm:$0xf] %vm404_vm5, %v399_v60 }
  0xfa   : > { %v462_v6 = vld [vmem:[#allocation5] sm:$0xf] }
 0x12b   : > { %v360_v62 = vpop.xlane.xlu1 %359 }
 0x12f   : > { %v366_v2 = vpop.xlane.xlu1 %365 }
 0x139   : > { %v385_v61 = vpop.xlane.xlu0 %384 }
 0x13a   : > { %406 = vst.msk [vmem:[#allocation3] sm:$0xf] %vm404_vm5, %v385_v61 }
 0x13d   : > { %v390_v63 = vpop.xlane.xlu0 %389 }
 0x13e   : > { %407 = vst.msk [vmem:[#allocation4] sm:$0xf] %vm404_vm5, %v390_v63 }
 0x141   : > { %v363_v50 = vpop.xlane.xlu0 %362  ;;  %v434_v3 = vld [vmem:[#allocation3] sm:$0xf] }
 0x142   : > { %v371_v4 = vsel %vm370_vm6, %v360_v62, %v363_v50  ;;  %437 = vperm.xlu1 %714, %v434_v3  }
 0x143   : > { %v373_v5 = vsel %vm372_vm7, %v371_v4, %v366_v2 }
 0x145   : > { %v369_v7 = vpop.xlane.xlu0 %368  ;;  %v448_v10 = vld [vmem:[#allocation4] sm:$0xf] }
 0x146   : > { %v375_v11 = vsel %vm374_vm8, %v373_v5, %v369_v7  ;;  %465 = vperm.xlu1 %714, %v462_v6   ;;  %451 = vperm.xlu0 %715, %v448_v10  }
 0x147   : > { %405 = vst.msk [vmem:[#allocation2] sm:$0xf] %vm404_vm5, %v375_v11 }
 0x14e   : > { %v477_v12 = vld [vmem:[#allocation2] sm:$0xf] }
 0x14f   : > { %480 = vperm.xlu1 %714, %v477_v12  }
 0x1c1   : > { %v438_v15 = vpop.permute.xlu1 %437 }
 0x1c2   : > { %v440_v17 = vmul.f32 %v638_v14, %v438_v15 }
 0x1c4   : > { %v441_v18 = vsel %vm242_vm0, %v440_v17, 0.0 }
 0x1c5   : > { %v442_v19 = vrot.slane %v441_v18, 4  ;;  %v466_v20 = vpop.permute.xlu1 %465  ;;  %v452_v21 = vpop.permute.xlu0 %451 }
 0x1c6   : > { %v468_v22 = vmul.f32 %v638_v14, %v466_v20  ;;  %v454_v23 = vmul.f32 %v638_v14, %v452_v21 }
 0x1c7   : > { %v443_v24 = vadd.f32 %v442_v19, %v441_v18 }
 0x1c8   : > { %v469_v25 = vsel %vm242_vm0, %v468_v22, 0.0  ;;  %v455_v26 = vsel %vm242_vm0, %v454_v23, 0.0 }
 0x1c9   : > { %v444_v27 = vrot.slane %v443_v24, 2  ;;  %v470_v0 = vrot.slane %v469_v25, 4  ;;  %v456_v28 = vrot.slane %v455_v26, 4 }
 0x1cb   : > { %v445_v1 = vadd.f32 %v444_v27, %v443_v24  ;;  %v471_v29 = vadd.f32 %v470_v0, %v469_v25  ;;  %v457_v16 = vadd.f32 %v456_v28, %v455_v26 }
 0x1cd   : > { %v446_v30 = vrot.slane %v445_v1, 1  ;;  %v472_v31 = vrot.slane %v471_v29, 2  ;;  %v458_v32 = vrot.slane %v457_v16, 2 }
 0x1ce   : > { %v481_v33 = vpop.permute.xlu1 %480 }
 0x1cf   : > { %v473_v34 = vadd.f32 %v472_v31, %v471_v29  ;;  %v459_v35 = vadd.f32 %v458_v32, %v457_v16  ;;  %v447_v37 = vadd.f32 %v446_v30, %v445_v1  ;;  %v483_v41 = vsel %vm476_vm10, %v481_v33, 0.0 }
 0x1d1   : > { %v474_v38 = vrot.slane %v473_v34, 1  ;;  %v460_v39 = vrot.slane %v459_v35, 1  ;;  %v484_v46 = vsel %vm242_vm0, %v483_v41, %v447_v37 }
 0x1d3   : > { %v475_v42 = vadd.f32 %v474_v38, %v473_v34  ;;  %v461_v43 = vadd.f32 %v460_v39, %v459_v35 }
 0x1d5   : > { %v486_v47 = vsel %vm485_vm11, %v484_v46, %v461_v43 }
 0x1d6   : > { %v488_v36 = vsel %vm487_vm12, %v486_v47, %v475_v42 }
 0x1d7   : > { %v490_v40 = vsel %vm489_vm13, %v488_v36, 0.0 }
 0x1d8   : > { %491 = vst [vmem:[%s232_s19] sm:$0xff] %v490_v40 }
 0x1d9   : > { %806 = shalt.err (!%p803_p2)
}
 0x1da   : > { %s807_s8 = scalar_lea.hbm %s1148_s27, 128  ;;  %s811_s4 = scalar_lea.hbm %s1199_s2, 256 }
 0x1db   : > { %p808_p9 = scmp.ne.s32.totalorder %s1148_s27, %s807_s8  ;;  %p812_p6 = scmp.lt.u32.totalorder %s1148_s27, %s1199_s2 }
 0x1dc   : > { %p813_p13 = scmp.lt.u32.totalorder %s811_s4, %s807_s8  ;;  %p815_p0 = scmp.lt.u32.totalorder %s807_s8, %s1148_s27 }
 0x1dd   : > { %p809_p11 = pnand %p808_p9, %p1212_p5 }
 0x1de   : > { %p814_p8 = por %p813_p13, %p812_p6 }
 0x1df   : > { %p810_p3 = pneg %p809_p11 }
 0x1e0   : > { %p816_p7 = por %p815_p0, %p814_p8 }
 0x1e2   : > { %p817_p4 = pnand %p816_p7, %p810_p3 }
 0x1e4   : > { %820 = shalt.err (!%p817_p4)
}
 0x1e5   : > { %649 = dma.vmem_to_hbm [thread:$0]  (%p1212_p5), %s1150_s30, 128, %s1148_s27, %s493_s12  }
 0x1e6 PF: > { %s519_s29 = sand.u32 1, %s859_s9   ;;  %p1213_p10 = scmp.ne.s32.totalorder %s1205_s24, 0 }
 0x1e7   : > { %p1214_p12 = scmp.ge.s32.totalorder %s879_s14, 2  ;;  %s520_s16 = scalar_lea.sflag [#allocation8], %s519_s29 }
 0x1e9   : > { %p659_p1 = pnand %p1214_p12, %p1213_p10 }
 0x1eb   : > { %854 = dma.done.wait (!%p659_p1), %s520_s16, 128  }
 0x1ec   : > { %856 = vsyncadd (!%p659_p1), %s520_s16, 4294967168  ;;  %s21_s14 = sadd.s32 1, %s879_s14   ;;  %s1215_s9 = smov %s863_s10 }
 0x1ed   : > { %p18_p2 = scmp.ge.s32.totalorder %s21_s14, 4   ;;  %s1216_s10 = smov %s867_s11 }
 0x1ee   : > { %s1217_s11 = smov %s957_s23  ;;  %s1218_s12 = smov %s875_s13 }
 0x1ef   : > { %s1219_s13 = smov %s1221_s17  ;;  %20 = sbr.rel (!%p18_p2) target bundleno = 8 (0x8), region = 98 }
 0x1f6   :  { %525 = vsyncpa [#allocation7], 1 }
 0x1f7   :  { %527 = vsyncpa [#allocation7 + $0x1], 1 }
 0x1f8   :  { %528 = vsyncpa [#allocation10], 1 }
 0x1f9   :  { %530 = vsyncpa [#allocation10 + $0x1], 1 }
 0x1fa   :  { %531 = vsyncpa [#allocation8], 1 }
 0x1fb   :  { %533 = vsyncpa [#allocation8 + $0x1], 1 }

</bundles_post_ra>
